<compile_context>
chip_gen: v6e
topology: v6e:2x2x1
jax: 0.10.0
libtpu: 0.0.40
codegen_flags: <defaults>
</compile_context>

<pallas_src>
import math
import jax
import jax.numpy as jnp
from jax.experimental import pallas as pl
from jax.experimental.pallas import tpu as pltpu


# ----------------------------------------------------------------------------- kernel

def _make_kernel(num_chains, rows_per_chain, num_rest_layers):
    """Builds the fused forward kernel for one (TB, feat) activation tile."""

    def kernel(x_ref, w1_ref, wrest_ref, b_ref, o_ref):
        # Per-chain activation slices (static, sublane-aligned row offsets).
        hs = [
            x_ref[pl.ds(c * rows_per_chain, rows_per_chain), :].astype(jnp.bfloat16)
            for c in range(num_chains)
        ]
        accs = [None] * num_chains
        biases = b_ref[...]                      # (8, P) f32, one tiny load

        # ---- layer 1: (rows, in_d) @ (in_d, P) ----
        w1 = w1_ref[...]
        b = biases[0:1, :]
        for c in range(num_chains):
            accs[c] = jnp.dot(hs[c], w1, preferred_element_type=jnp.float32)
        for c in range(num_chains):
            accs[c] = jnp.maximum(accs[c] + b, 0.0)
            hs[c] = accs[c].astype(jnp.bfloat16)

        # ---- layers 2..8: (rows, P) @ (P, P) ----
        for l in range(num_rest_layers):
            w = wrest_ref[l]                     # (P, P) bf16, static index
            b = biases[l + 1:l + 2, :]
            for c in range(num_chains):
                accs[c] = jnp.dot(hs[c], w, preferred_element_type=jnp.float32)
            for c in range(num_chains):
                accs[c] = jnp.maximum(accs[c] + b, 0.0)
                hs[c] = accs[c].astype(jnp.bfloat16)

        # ---- bf16 writeback (lane-dense, 128-wide block) ----
        for c in range(num_chains):
            o_ref[pl.ds(c * rows_per_chain, rows_per_chain), :] = hs[c]

    return kernel


# ----------------------------------------------------------------------------- params

def _round_up(n, m):
    return ((n + m - 1) // m) * m


def prepare_params(params, compute_dtype=jnp.bfloat16):
    """One-time preprocessing of PyTorch-layout (out,in) Linear params.

    Returns (w1, w_rest, biases):
      w1     : (in_d, P)    compute_dtype   transposed layer-1 weight, cols zero-padded
      w_rest : (7, P, P)    compute_dtype   transposed layers 2..8, zero-padded
      biases : (8, P)       f32             zero-padded biases (f32 epilogue)
    where P = max hidden/output width rounded up to 128 (lane-dense everywhere).
    """
    assert len(params) == 8
    out_dims = [int(w.shape[0]) for w, _ in params]
    in_d = int(params[0][0].shape[1])
    P = max(_round_up(d, 128) for d in out_dims)

    w1 = jnp.asarray(params[0][0], jnp.float32)
    w1_t = jnp.zeros((in_d, P), jnp.float32).at[:, :out_dims[0]].set(w1.T)

    w_rest = []
    for w, _ in params[1:]:
        w = jnp.asarray(w, jnp.float32)
        o, i = w.shape
        w_rest.append(jnp.zeros((P, P), jnp.float32).at[:i, :o].set(w.T))
    w_rest = jnp.stack(w_rest)

    biases = jnp.zeros((len(params), P), jnp.float32)
    for li, (_, b) in enumerate(params):
        b = jnp.asarray(b, jnp.float32)
        biases = biases.at[li, :b.shape[0]].set(b)

    return (w1_t.astype(compute_dtype), w_rest.astype(compute_dtype), biases)


# ----------------------------------------------------------------------------- wrapper

def music_net_forward(x, prepared, *, out_dim, tb=256, num_chains=2):
    """x: (batch, input_size_sf) f32 (unpadded). prepared: output of prepare_params."""
    w1, w_rest, biases = prepared
    batch, in_d = x.shape
    assert in_d == w1.shape[0], "input feature dim mismatch with prepared params"
    P = w1.shape[1]
    num_rest = w_rest.shape[0]

    # Batch tile: keep it as large as possible, but never larger than needed.
    tb = _round_up(max(8, min(tb, _round_up(batch, 8))), 8)
    if tb % (8 * num_chains) != 0:
        num_chains = 1
    padded_batch = _round_up(batch, tb)
    if padded_batch != batch:
        # Only triggered when batch % tb != 0 (rows only, no lane padding).
        x = jnp.zeros((padded_batch, in_d), x.dtype).at[:batch].set(x)

    kernel = _make_kernel(num_chains, tb // num_chains, num_rest)

    out_padded = pl.pallas_call(
        kernel,
        out_shape=jax.ShapeDtypeStruct((padded_batch, P), jnp.bfloat16),
        grid=(padded_batch // tb,),
        in_specs=[
            # activations: tiled along batch, full (unpadded) feature dim
            pl.BlockSpec((tb, in_d), lambda i: (i, 0)),
            # params: full-array blocks, constant index -> VMEM resident across steps
            pl.BlockSpec(w1.shape, lambda i: (0, 0)),
            pl.BlockSpec(w_rest.shape, lambda i: (0, 0, 0)),
            pl.BlockSpec(biases.shape, lambda i: (0, 0)),
        ],
        out_specs=pl.BlockSpec((tb, P), lambda i: (i, 0)),
        compiler_params=pltpu.CompilerParams(
            dimension_semantics=("parallel",)),
    )(x, w1, w_rest, biases)

    # Slice away padding, upcast the (tiny) real output to f32 for the caller.
    return out_padded[:batch, :out_dim].astype(jnp.float32)


# ----------------------------------------------------------------------------- params / reference

def make_params(key, input_size_sf, output_size_music, sf_num):
    """Deterministic synthetic params matching MUSIC_NET.__init__ layer shapes."""
    in_sz = input_size_sf
    dims = [
        in_sz,
        int(in_sz / 4),
        int(in_sz / 8),
        int(in_sz / 10),
        int(in_sz / 10),
        int(in_sz / 10),
        int(in_sz / 10),
        int(in_sz / 20),
        int(output_size_music / sf_num),
    ]
    params = []
    for i in range(8):
        fan_in, fan_out = dims[i], dims[i + 1]
        key, kw, kb = jax.random.split(key, 3)
        bound = 1.0 / math.sqrt(fan_in)
        w = jax.random.uniform(kw, (fan_out, fan_in), jnp.float32, -bound, bound)
        b = jax.random.uniform(kb, (fan_out,), jnp.float32, -bound, bound)
        params.append((w, b))
    return params


def reference_forward_f32(x, params):
    h = x
    for w, b in params:
        h = jnp.maximum(h @ w.T + b, 0.0)
    return h


def reference_forward_bf16(x, params):
    """Same math as the kernel: bf16 matmul inputs, f32 accumulation/epilogue."""
    h = x.astype(jnp.bfloat16)
    acc = None
    for w, b in params:
        acc = jnp.dot(h, w.T.astype(jnp.bfloat16),
                      preferred_element_type=jnp.float32)
        acc = jnp.maximum(acc + b.astype(jnp.float32), 0.0)
        h = acc.astype(jnp.bfloat16)
    return acc


# ----------------------------------------------------------------------------- main

if __name__ == "__main__":
    key = jax.random.PRNGKey(0)

    # input_size_sf=160 -> layer widths 160/40/20/16/16/16/16/8 -> out 64/4 = 16.
    input_size_sf = 160
    output_size_music = 64
    sf_num = 4
    out_dim = int(output_size_music / sf_num)

    params = make_params(key, input_size_sf, output_size_music, sf_num)
    prepared = prepare_params(params)          # hoisted: transpose / pad / bf16 once
    forward = jax.jit(music_net_forward,
                      static_argnames=("out_dim", "tb", "num_chains"))

    def check(batch, tb):
        k = jax.random.fold_in(key, batch)
        x = jax.random.normal(k, (batch, input_size_sf), jnp.float32)
        out = forward(x, prepared, out_dim=out_dim, tb=tb)
        out = jax.block_until_ready(out)
        assert out.shape == (batch, out_dim)
        # Tight check vs. a reference doing identical bf16/f32 math (output also
        # rounded through bf16, like the kernel's writeback).
        ref = reference_forward_bf16(x, params)
        ref_q = ref.astype(jnp.bfloat16).astype(jnp.float32)
        assert jnp.allclose(out, ref_q, atol=5e-3, rtol=5e-3)
        # Loose sanity check vs. full-f32 reference.
        ref_f32 = reference_forward_f32(x, params)
        assert jnp.allclose(out, ref_f32, atol=5e-2, rtol=5e-2)

    # Main demo: 2-step "parallel" grid with TB=256 (shards across TCs on v7x).
    check(batch=512, tb=256)
    # Small-batch / serving path: single grid step, two interleaved 8-row chains.
    check(batch=16, tb=256)

    print("KERNEL_OK")
</pallas_src>

<mosaic_0001>
module attributes {stable_mosaic.version = 11 : i64} {
  func.func @kernel(%arg0: i32, %arg1: memref<256x160xf32, #tpu.memory_space<vmem>>, %arg2: memref<160x128xbf16, #tpu.memory_space<vmem>>, %arg3: memref<7x128x128xbf16, #tpu.memory_space<vmem>>, %arg4: memref<8x128xf32, #tpu.memory_space<vmem>>, %arg5: memref<256x128xbf16, #tpu.memory_space<vmem>>) attributes {dimension_semantics = [#tpu.dimension_semantics<parallel>], iteration_bounds = array<i64: 2>, scalar_prefetch = 0 : i64, scratch_operands = 0 : i64, tpu.core_type = #tpu.core_type<tc>, window_params = [{transform_indices = @transform_0, window_bounds = array<i64: 256, 160>}, {pipeline_mode = #tpu.pipeline_mode<synchronous>, transform_indices = @transform_1, window_bounds = array<i64: 160, 128>}, {pipeline_mode = #tpu.pipeline_mode<synchronous>, transform_indices = @transform_2, window_bounds = array<i64: 7, 128, 128>}, {pipeline_mode = #tpu.pipeline_mode<synchronous>, transform_indices = @transform_3, window_bounds = array<i64: 8, 128>}, {transform_indices = @transform_4, window_bounds = array<i64: 256, 128>}]} {
    %c0 = arith.constant 0 : index
    %c0_0 = arith.constant 0 : index
    %0 = vector.load %arg1[%c0, %c0_0] : memref<256x160xf32, #tpu.memory_space<vmem>>, vector<128x160xf32>
    %1 = arith.truncf %0 : vector<128x160xf32> to vector<128x160xbf16>
    %c128 = arith.constant 128 : index
    %c0_1 = arith.constant 0 : index
    %2 = vector.load %arg1[%c128, %c0_1] : memref<256x160xf32, #tpu.memory_space<vmem>>, vector<128x160xf32>
    %3 = arith.truncf %2 : vector<128x160xf32> to vector<128x160xbf16>
    %c0_2 = arith.constant 0 : index
    %c0_3 = arith.constant 0 : index
    %4 = vector.load %arg4[%c0_2, %c0_3] : memref<8x128xf32, #tpu.memory_space<vmem>>, vector<8x128xf32>
    %c0_4 = arith.constant 0 : index
    %c0_5 = arith.constant 0 : index
    %5 = vector.load %arg2[%c0_4, %c0_5] : memref<160x128xbf16, #tpu.memory_space<vmem>>, vector<160x128xbf16>
    %6 = vector.extract_strided_slice %4 {offsets = [0, 0], sizes = [1, 128], strides = [1, 1]} : vector<8x128xf32> to vector<1x128xf32>
    %cst = arith.constant dense<0.000000e+00> : vector<128x128xf32>
    %7 = tpu.matmul %1, %5, %cst {dimension_numbers = #tpu.dot_dimension_numbers<[1], [0], [0], [1], [0, 0, 1, 1], [], []>} : vector<128x160xbf16>, vector<160x128xbf16>, vector<128x128xf32> -> vector<128x128xf32>
    %cst_6 = arith.constant dense<0.000000e+00> : vector<128x128xf32>
    %8 = tpu.matmul %3, %5, %cst_6 {dimension_numbers = #tpu.dot_dimension_numbers<[1], [0], [0], [1], [0, 0, 1, 1], [], []>} : vector<128x160xbf16>, vector<160x128xbf16>, vector<128x128xf32> -> vector<128x128xf32>
    %9 = vector.broadcast %6 : vector<1x128xf32> to vector<128x128xf32>
    %10 = arith.addf %7, %9 : vector<128x128xf32>
    %cst_7 = arith.constant 0.000000e+00 : f32
    %11 = vector.broadcast %cst_7 : f32 to vector<128x128xf32>
    %12 = arith.maximumf %10, %11 : vector<128x128xf32>
    %13 = arith.truncf %12 : vector<128x128xf32> to vector<128x128xbf16>
    %14 = vector.broadcast %6 : vector<1x128xf32> to vector<128x128xf32>
    %15 = arith.addf %8, %14 : vector<128x128xf32>
    %cst_8 = arith.constant 0.000000e+00 : f32
    %16 = vector.broadcast %cst_8 : f32 to vector<128x128xf32>
    %17 = arith.maximumf %15, %16 : vector<128x128xf32>
    %18 = arith.truncf %17 : vector<128x128xf32> to vector<128x128xbf16>
    %c0_9 = arith.constant 0 : index
    %c0_10 = arith.constant 0 : index
    %c0_11 = arith.constant 0 : index
    %19 = vector.load %arg3[%c0_9, %c0_10, %c0_11] : memref<7x128x128xbf16, #tpu.memory_space<vmem>>, vector<1x128x128xbf16>
    %20 = vector.shape_cast %19 : vector<1x128x128xbf16> to vector<128x128xbf16>
    %21 = vector.extract_strided_slice %4 {offsets = [1, 0], sizes = [1, 128], strides = [1, 1]} : vector<8x128xf32> to vector<1x128xf32>
    %cst_12 = arith.constant dense<0.000000e+00> : vector<128x128xf32>
    %22 = tpu.matmul %13, %20, %cst_12 {dimension_numbers = #tpu.dot_dimension_numbers<[1], [0], [0], [1], [0, 0, 1, 1], [], []>} : vector<128x128xbf16>, vector<128x128xbf16>, vector<128x128xf32> -> vector<128x128xf32>
    %cst_13 = arith.constant dense<0.000000e+00> : vector<128x128xf32>
    %23 = tpu.matmul %18, %20, %cst_13 {dimension_numbers = #tpu.dot_dimension_numbers<[1], [0], [0], [1], [0, 0, 1, 1], [], []>} : vector<128x128xbf16>, vector<128x128xbf16>, vector<128x128xf32> -> vector<128x128xf32>
    %24 = vector.broadcast %21 : vector<1x128xf32> to vector<128x128xf32>
    %25 = arith.addf %22, %24 : vector<128x128xf32>
    %cst_14 = arith.constant 0.000000e+00 : f32
    %26 = vector.broadcast %cst_14 : f32 to vector<128x128xf32>
    %27 = arith.maximumf %25, %26 : vector<128x128xf32>
    %28 = arith.truncf %27 : vector<128x128xf32> to vector<128x128xbf16>
    %29 = vector.broadcast %21 : vector<1x128xf32> to vector<128x128xf32>
    %30 = arith.addf %23, %29 : vector<128x128xf32>
    %cst_15 = arith.constant 0.000000e+00 : f32
    %31 = vector.broadcast %cst_15 : f32 to vector<128x128xf32>
    %32 = arith.maximumf %30, %31 : vector<128x128xf32>
    %33 = arith.truncf %32 : vector<128x128xf32> to vector<128x128xbf16>
    %c1 = arith.constant 1 : index
    %c0_16 = arith.constant 0 : index
    %c0_17 = arith.constant 0 : index
    %34 = vector.load %arg3[%c1, %c0_16, %c0_17] : memref<7x128x128xbf16, #tpu.memory_space<vmem>>, vector<1x128x128xbf16>
    %35 = vector.shape_cast %34 : vector<1x128x128xbf16> to vector<128x128xbf16>
    %36 = vector.extract_strided_slice %4 {offsets = [2, 0], sizes = [1, 128], strides = [1, 1]} : vector<8x128xf32> to vector<1x128xf32>
    %cst_18 = arith.constant dense<0.000000e+00> : vector<128x128xf32>
    %37 = tpu.matmul %28, %35, %cst_18 {dimension_numbers = #tpu.dot_dimension_numbers<[1], [0], [0], [1], [0, 0, 1, 1], [], []>} : vector<128x128xbf16>, vector<128x128xbf16>, vector<128x128xf32> -> vector<128x128xf32>
    %cst_19 = arith.constant dense<0.000000e+00> : vector<128x128xf32>
    %38 = tpu.matmul %33, %35, %cst_19 {dimension_numbers = #tpu.dot_dimension_numbers<[1], [0], [0], [1], [0, 0, 1, 1], [], []>} : vector<128x128xbf16>, vector<128x128xbf16>, vector<128x128xf32> -> vector<128x128xf32>
    %39 = vector.broadcast %36 : vector<1x128xf32> to vector<128x128xf32>
    %40 = arith.addf %37, %39 : vector<128x128xf32>
    %cst_20 = arith.constant 0.000000e+00 : f32
    %41 = vector.broadcast %cst_20 : f32 to vector<128x128xf32>
    %42 = arith.maximumf %40, %41 : vector<128x128xf32>
    %43 = arith.truncf %42 : vector<128x128xf32> to vector<128x128xbf16>
    %44 = vector.broadcast %36 : vector<1x128xf32> to vector<128x128xf32>
    %45 = arith.addf %38, %44 : vector<128x128xf32>
    %cst_21 = arith.constant 0.000000e+00 : f32
    %46 = vector.broadcast %cst_21 : f32 to vector<128x128xf32>
    %47 = arith.maximumf %45, %46 : vector<128x128xf32>
    %48 = arith.truncf %47 : vector<128x128xf32> to vector<128x128xbf16>
    %c2 = arith.constant 2 : index
    %c0_22 = arith.constant 0 : index
    %c0_23 = arith.constant 0 : index
    %49 = vector.load %arg3[%c2, %c0_22, %c0_23] : memref<7x128x128xbf16, #tpu.memory_space<vmem>>, vector<1x128x128xbf16>
    %50 = vector.shape_cast %49 : vector<1x128x128xbf16> to vector<128x128xbf16>
    %51 = vector.extract_strided_slice %4 {offsets = [3, 0], sizes = [1, 128], strides = [1, 1]} : vector<8x128xf32> to vector<1x128xf32>
    %cst_24 = arith.constant dense<0.000000e+00> : vector<128x128xf32>
    %52 = tpu.matmul %43, %50, %cst_24 {dimension_numbers = #tpu.dot_dimension_numbers<[1], [0], [0], [1], [0, 0, 1, 1], [], []>} : vector<128x128xbf16>, vector<128x128xbf16>, vector<128x128xf32> -> vector<128x128xf32>
    %cst_25 = arith.constant dense<0.000000e+00> : vector<128x128xf32>
    %53 = tpu.matmul %48, %50, %cst_25 {dimension_numbers = #tpu.dot_dimension_numbers<[1], [0], [0], [1], [0, 0, 1, 1], [], []>} : vector<128x128xbf16>, vector<128x128xbf16>, vector<128x128xf32> -> vector<128x128xf32>
    %54 = vector.broadcast %51 : vector<1x128xf32> to vector<128x128xf32>
    %55 = arith.addf %52, %54 : vector<128x128xf32>
    %cst_26 = arith.constant 0.000000e+00 : f32
    %56 = vector.broadcast %cst_26 : f32 to vector<128x128xf32>
    %57 = arith.maximumf %55, %56 : vector<128x128xf32>
    %58 = arith.truncf %57 : vector<128x128xf32> to vector<128x128xbf16>
    %59 = vector.broadcast %51 : vector<1x128xf32> to vector<128x128xf32>
    %60 = arith.addf %53, %59 : vector<128x128xf32>
    %cst_27 = arith.constant 0.000000e+00 : f32
    %61 = vector.broadcast %cst_27 : f32 to vector<128x128xf32>
    %62 = arith.maximumf %60, %61 : vector<128x128xf32>
    %63 = arith.truncf %62 : vector<128x128xf32> to vector<128x128xbf16>
    %c3 = arith.constant 3 : index
    %c0_28 = arith.constant 0 : index
    %c0_29 = arith.constant 0 : index
    %64 = vector.load %arg3[%c3, %c0_28, %c0_29] : memref<7x128x128xbf16, #tpu.memory_space<vmem>>, vector<1x128x128xbf16>
    %65 = vector.shape_cast %64 : vector<1x128x128xbf16> to vector<128x128xbf16>
    %66 = vector.extract_strided_slice %4 {offsets = [4, 0], sizes = [1, 128], strides = [1, 1]} : vector<8x128xf32> to vector<1x128xf32>
    %cst_30 = arith.constant dense<0.000000e+00> : vector<128x128xf32>
    %67 = tpu.matmul %58, %65, %cst_30 {dimension_numbers = #tpu.dot_dimension_numbers<[1], [0], [0], [1], [0, 0, 1, 1], [], []>} : vector<128x128xbf16>, vector<128x128xbf16>, vector<128x128xf32> -> vector<128x128xf32>
    %cst_31 = arith.constant dense<0.000000e+00> : vector<128x128xf32>
    %68 = tpu.matmul %63, %65, %cst_31 {dimension_numbers = #tpu.dot_dimension_numbers<[1], [0], [0], [1], [0, 0, 1, 1], [], []>} : vector<128x128xbf16>, vector<128x128xbf16>, vector<128x128xf32> -> vector<128x128xf32>
    %69 = vector.broadcast %66 : vector<1x128xf32> to vector<128x128xf32>
    %70 = arith.addf %67, %69 : vector<128x128xf32>
    %cst_32 = arith.constant 0.000000e+00 : f32
    %71 = vector.broadcast %cst_32 : f32 to vector<128x128xf32>
    %72 = arith.maximumf %70, %71 : vector<128x128xf32>
    %73 = arith.truncf %72 : vector<128x128xf32> to vector<128x128xbf16>
    %74 = vector.broadcast %66 : vector<1x128xf32> to vector<128x128xf32>
    %75 = arith.addf %68, %74 : vector<128x128xf32>
    %cst_33 = arith.constant 0.000000e+00 : f32
    %76 = vector.broadcast %cst_33 : f32 to vector<128x128xf32>
    %77 = arith.maximumf %75, %76 : vector<128x128xf32>
    %78 = arith.truncf %77 : vector<128x128xf32> to vector<128x128xbf16>
    %c4 = arith.constant 4 : index
    %c0_34 = arith.constant 0 : index
    %c0_35 = arith.constant 0 : index
    %79 = vector.load %arg3[%c4, %c0_34, %c0_35] : memref<7x128x128xbf16, #tpu.memory_space<vmem>>, vector<1x128x128xbf16>
    %80 = vector.shape_cast %79 : vector<1x128x128xbf16> to vector<128x128xbf16>
    %81 = vector.extract_strided_slice %4 {offsets = [5, 0], sizes = [1, 128], strides = [1, 1]} : vector<8x128xf32> to vector<1x128xf32>
    %cst_36 = arith.constant dense<0.000000e+00> : vector<128x128xf32>
    %82 = tpu.matmul %73, %80, %cst_36 {dimension_numbers = #tpu.dot_dimension_numbers<[1], [0], [0], [1], [0, 0, 1, 1], [], []>} : vector<128x128xbf16>, vector<128x128xbf16>, vector<128x128xf32> -> vector<128x128xf32>
    %cst_37 = arith.constant dense<0.000000e+00> : vector<128x128xf32>
    %83 = tpu.matmul %78, %80, %cst_37 {dimension_numbers = #tpu.dot_dimension_numbers<[1], [0], [0], [1], [0, 0, 1, 1], [], []>} : vector<128x128xbf16>, vector<128x128xbf16>, vector<128x128xf32> -> vector<128x128xf32>
    %84 = vector.broadcast %81 : vector<1x128xf32> to vector<128x128xf32>
    %85 = arith.addf %82, %84 : vector<128x128xf32>
    %cst_38 = arith.constant 0.000000e+00 : f32
    %86 = vector.broadcast %cst_38 : f32 to vector<128x128xf32>
    %87 = arith.maximumf %85, %86 : vector<128x128xf32>
    %88 = arith.truncf %87 : vector<128x128xf32> to vector<128x128xbf16>
    %89 = vector.broadcast %81 : vector<1x128xf32> to vector<128x128xf32>
    %90 = arith.addf %83, %89 : vector<128x128xf32>
    %cst_39 = arith.constant 0.000000e+00 : f32
    %91 = vector.broadcast %cst_39 : f32 to vector<128x128xf32>
    %92 = arith.maximumf %90, %91 : vector<128x128xf32>
    %93 = arith.truncf %92 : vector<128x128xf32> to vector<128x128xbf16>
    %c5 = arith.constant 5 : index
    %c0_40 = arith.constant 0 : index
    %c0_41 = arith.constant 0 : index
    %94 = vector.load %arg3[%c5, %c0_40, %c0_41] : memref<7x128x128xbf16, #tpu.memory_space<vmem>>, vector<1x128x128xbf16>
    %95 = vector.shape_cast %94 : vector<1x128x128xbf16> to vector<128x128xbf16>
    %96 = vector.extract_strided_slice %4 {offsets = [6, 0], sizes = [1, 128], strides = [1, 1]} : vector<8x128xf32> to vector<1x128xf32>
    %cst_42 = arith.constant dense<0.000000e+00> : vector<128x128xf32>
    %97 = tpu.matmul %88, %95, %cst_42 {dimension_numbers = #tpu.dot_dimension_numbers<[1], [0], [0], [1], [0, 0, 1, 1], [], []>} : vector<128x128xbf16>, vector<128x128xbf16>, vector<128x128xf32> -> vector<128x128xf32>
    %cst_43 = arith.constant dense<0.000000e+00> : vector<128x128xf32>
    %98 = tpu.matmul %93, %95, %cst_43 {dimension_numbers = #tpu.dot_dimension_numbers<[1], [0], [0], [1], [0, 0, 1, 1], [], []>} : vector<128x128xbf16>, vector<128x128xbf16>, vector<128x128xf32> -> vector<128x128xf32>
    %99 = vector.broadcast %96 : vector<1x128xf32> to vector<128x128xf32>
    %100 = arith.addf %97, %99 : vector<128x128xf32>
    %cst_44 = arith.constant 0.000000e+00 : f32
    %101 = vector.broadcast %cst_44 : f32 to vector<128x128xf32>
    %102 = arith.maximumf %100, %101 : vector<128x128xf32>
    %103 = arith.truncf %102 : vector<128x128xf32> to vector<128x128xbf16>
    %104 = vector.broadcast %96 : vector<1x128xf32> to vector<128x128xf32>
    %105 = arith.addf %98, %104 : vector<128x128xf32>
    %cst_45 = arith.constant 0.000000e+00 : f32
    %106 = vector.broadcast %cst_45 : f32 to vector<128x128xf32>
    %107 = arith.maximumf %105, %106 : vector<128x128xf32>
    %108 = arith.truncf %107 : vector<128x128xf32> to vector<128x128xbf16>
    %c6 = arith.constant 6 : index
    %c0_46 = arith.constant 0 : index
    %c0_47 = arith.constant 0 : index
    %109 = vector.load %arg3[%c6, %c0_46, %c0_47] : memref<7x128x128xbf16, #tpu.memory_space<vmem>>, vector<1x128x128xbf16>
    %110 = vector.shape_cast %109 : vector<1x128x128xbf16> to vector<128x128xbf16>
    %111 = vector.extract_strided_slice %4 {offsets = [7, 0], sizes = [1, 128], strides = [1, 1]} : vector<8x128xf32> to vector<1x128xf32>
    %cst_48 = arith.constant dense<0.000000e+00> : vector<128x128xf32>
    %112 = tpu.matmul %103, %110, %cst_48 {dimension_numbers = #tpu.dot_dimension_numbers<[1], [0], [0], [1], [0, 0, 1, 1], [], []>} : vector<128x128xbf16>, vector<128x128xbf16>, vector<128x128xf32> -> vector<128x128xf32>
    %cst_49 = arith.constant dense<0.000000e+00> : vector<128x128xf32>
    %113 = tpu.matmul %108, %110, %cst_49 {dimension_numbers = #tpu.dot_dimension_numbers<[1], [0], [0], [1], [0, 0, 1, 1], [], []>} : vector<128x128xbf16>, vector<128x128xbf16>, vector<128x128xf32> -> vector<128x128xf32>
    %114 = vector.broadcast %111 : vector<1x128xf32> to vector<128x128xf32>
    %115 = arith.addf %112, %114 : vector<128x128xf32>
    %cst_50 = arith.constant 0.000000e+00 : f32
    %116 = vector.broadcast %cst_50 : f32 to vector<128x128xf32>
    %117 = arith.maximumf %115, %116 : vector<128x128xf32>
    %118 = arith.truncf %117 : vector<128x128xf32> to vector<128x128xbf16>
    %119 = vector.broadcast %111 : vector<1x128xf32> to vector<128x128xf32>
    %120 = arith.addf %113, %119 : vector<128x128xf32>
    %cst_51 = arith.constant 0.000000e+00 : f32
    %121 = vector.broadcast %cst_51 : f32 to vector<128x128xf32>
    %122 = arith.maximumf %120, %121 : vector<128x128xf32>
    %123 = arith.truncf %122 : vector<128x128xf32> to vector<128x128xbf16>
    %c0_52 = arith.constant 0 : index
    %c0_53 = arith.constant 0 : index
    %124 = vector.load %arg5[%c0_52, %c0_53] : memref<256x128xbf16, #tpu.memory_space<vmem>>, vector<128x128xbf16>
    tpu.vector_store %arg5[%c0_52, %c0_53], %118 {strides = array<i32>} : memref<256x128xbf16, #tpu.memory_space<vmem>>, vector<128x128xbf16>,
    %c128_54 = arith.constant 128 : index
    %c0_55 = arith.constant 0 : index
    %125 = vector.load %arg5[%c128_54, %c0_55] : memref<256x128xbf16, #tpu.memory_space<vmem>>, vector<128x128xbf16>
    tpu.vector_store %arg5[%c128_54, %c0_55], %123 {strides = array<i32>} : memref<256x128xbf16, #tpu.memory_space<vmem>>, vector<128x128xbf16>,
    return
  }
  func.func @transform_0(%arg0: i32) -> (i32, i32) {
    %c0_i32 = arith.constant 0 : i32
    %c0_i32_0 = arith.constant 0 : i32
    return %arg0, %c0_i32 : i32, i32
  }
  func.func @transform_1(%arg0: i32) -> (i32, i32) {
    %c0_i32 = arith.constant 0 : i32
    %c0_i32_0 = arith.constant 0 : i32
    %c0_i32_1 = arith.constant 0 : i32
    return %c0_i32, %c0_i32_0 : i32, i32
  }
  func.func @transform_2(%arg0: i32) -> (i32, i32, i32) {
    %c0_i32 = arith.constant 0 : i32
    %c0_i32_0 = arith.constant 0 : i32
    %c0_i32_1 = arith.constant 0 : i32
    %c0_i32_2 = arith.constant 0 : i32
    return %c0_i32, %c0_i32_0, %c0_i32_1 : i32, i32, i32
  }
  func.func @transform_3(%arg0: i32) -> (i32, i32) {
    %c0_i32 = arith.constant 0 : i32
    %c0_i32_0 = arith.constant 0 : i32
    %c0_i32_1 = arith.constant 0 : i32
    return %c0_i32, %c0_i32_0 : i32, i32
  }
  func.func @transform_4(%arg0: i32) -> (i32, i32) {
    %c0_i32 = arith.constant 0 : i32
    %c0_i32_0 = arith.constant 0 : i32
    return %arg0, %c0_i32 : i32, i32
  }
}

</mosaic_0001>

<bundles_post_ra>
// kernel: music_net_forward.1
= control target key start
LH: loop header
LB: loop body
LE: loop exit
PB: predicated region body
PF: predicated region fallthrough
CT: control target
= control target key end

     0   :  { %s4186_s15 = smov 0   ;;  %s4827_s0 = inlined_call_operand.vmem [shape: f32[512,160], index: 0, kind: input, shape index: {}]   ;;  %s4828_s1 = inlined_call_operand.vmem [shape: bf16[160,128], index: 1, kind: input, shape index: {}]   ;;  %s4829_s2 = inlined_call_operand.vmem [shape: bf16[7,128,128], index: 2, kind: input, shape index: {}]   ;;  %s4830_s3 = inlined_call_operand.vmem [shape: f32[8,128], index: 3, kind: input, shape index: {}]   ;;  %s4831_s4 = inlined_call_operand.vmem [shape: bf16[512,128], index: 4, kind: output, shape index: {}]  }
   0x1 LB: > { %s3053_s16 = sadd.s32 4294967295, %s4158_s15   ;;  %p3057_p0 = scmp.ge.s32.totalorder %s4158_s15, 1  ;;  %s4158_s15 = sphi %s4186_s15, %s14_s15  }
   0x2   : > { %p164_p1 = scmp.lt.s32.totalorder %s4158_s15, 3 }
   0x4   : > { %p165_p2 = pnand %p3057_p0, %p164_p1 }
   0x5   : > { %s3058_s19 = sshll.u32 (!%p165_p2), %s3053_s16, 5 }
   0x6   : > { %168 = sbr.rel (%p165_p2) target bundleno = 1753 (0x6d9), region = 36  ;;  %p192_p3 = scmp.lt.s32.totalorder (!%p165_p2), %s3058_s19, 63 }
   0xb   : > { %v4084_v0 = vld [vmem:[%s4828_s1 + $0x38] sm:$0xff]   ;;  %v4160_v1 = vmov 0   ;;  %v4085_v2 = vld [vmem:[%s4828_s1 + $0x30] sm:$0xff]   ;;  %s4833_s19 = smov (!%p192_p3, %s3058_s19), 63  ;;  %v4086_v3 = vld [vmem:[%s4828_s1 + $0x28] sm:$0xff]   ;;  %vm386_vm0 = vcmask 261120  }
   0xc   : > { %411 = vmatprep.subr.bf16.mxu0 %v4160_v1  ;;  %556 = vmatprep.subr.bf16.mxu1 %v4160_v1  ;;  %s3275_s24 = sshll.u32 %s4833_s19, 4  ;;  %v4087_v4 = vld [vmem:[%s4828_s1 + $0x20] sm:$0xff]   ;;  %v4088_v11 = vld [vmem:[%s4828_s1 + $0x18] sm:$0xff]   ;;  %v4089_v12 = vld [vmem:[%s4828_s1 + $0x10] sm:$0xff]   ;;  %s3062_s14 = sshll.u32 %s4833_s19, 2 }
   0xd   : > { %412 = vmatpush1.bf16.msra.mxu0 %v4084_v0  ;;  %557 = vmatpush1.bf16.msra.mxu1 %v4084_v0  ;;  %s4215_s27 = scalar_lea.vmem %s4827_s0, %s3275_s24  ;;  %v4090_v13 = vld [vmem:[%s4828_s1 + $0x8] sm:$0xff]   ;;  %v4091_v14 = vld [vmem:[%s4828_s1] sm:$0xff]   ;;  %v4094_v25 = vld [vmem:[%s4829_s2 + $0x38] sm:$0xff]   ;;  %s4782_s19 = scalar_lea.vmem %s4831_s4, %s3062_s14 }
   0xe   : > { %413 = vmatprep.subr.bf16.mxu0 %v4160_v1  ;;  %558 = vmatprep.subr.bf16.mxu1 %v4160_v1  ;;  %v206_v5 = vld [vmem:[%s4215_s27 + $0x8] sm:$0xff]  ;;  %v208_v6 = vld [vmem:[%s4215_s27 + $0x18] sm:$0xff]  ;;  %v4093_v16 = vld [vmem:[%s4828_s1 + $0x40] sm:$0xff]  }
   0xf   : > { %v254_v7 = vld [vmem:[%s4215_s27 + $0x108] sm:$0xff]  ;;  %v238_v8 = vpack.c.bf16 %v208_v6, %v206_v5  ;;  %v256_v9 = vld [vmem:[%s4215_s27 + $0x118] sm:$0xff]  ;;  %v205_v17 = vld [vmem:[%s4215_s27] sm:$0xff] }
  0x10   : > { %v286_v10 = vpack.c.bf16 %v256_v9, %v254_v7  ;;  %v4092_v15 = vld [vmem:[%s4828_s1 + $0x48] sm:$0xff]   ;;  %v207_v18 = vld [vmem:[%s4215_s27 + $0x10] sm:$0xff]  ;;  %v253_v19 = vld [vmem:[%s4215_s27 + $0x100] sm:$0xff] }
  0x11   : > { %414 = vmatpush1.bf16.msra.mxu0 %v4085_v2  ;;  %559 = vmatpush1.bf16.msra.mxu1 %v4085_v2  ;;  %v255_v20 = vld [vmem:[%s4215_s27 + $0x110] sm:$0xff]  ;;  %v210_v21 = vld [vmem:[%s4215_s27 + $0x28] sm:$0xff]  ;;  %v212_v22 = vld [vmem:[%s4215_s27 + $0x38] sm:$0xff]  ;;  %v237_v26 = vpack.c.bf16 %v207_v18, %v205_v17 }
  0x12   : > { %415 = vmatprep.subr.bf16.mxu0 %v4160_v1  ;;  %560 = vmatprep.subr.bf16.mxu1 %v4160_v1  ;;  %v258_v23 = vld [vmem:[%s4215_s27 + $0x128] sm:$0xff]  ;;  %v260_v24 = vld [vmem:[%s4215_s27 + $0x138] sm:$0xff]  ;;  %v285_v27 = vpack.c.bf16 %v255_v20, %v253_v19  ;;  %v240_v28 = vpack.c.bf16 %v212_v22, %v210_v21  ;;  %v4095_v30 = vld [vmem:[%s4829_s2 + $0x30] sm:$0xff]  }
  0x13   : > { %3073 = vmatprep.mubr.msk.bf16.mxu0 %vm386_vm0, %v238_v8  ;;  %3081 = vmatprep.mubr.msk.bf16.mxu1 %vm386_vm0, %v286_v10  ;;  %v288_v29 = vpack.c.bf16 %v260_v24, %v258_v23  ;;  %v209_v31 = vld [vmem:[%s4215_s27 + $0x20] sm:$0xff]  ;;  %v211_v32 = vld [vmem:[%s4215_s27 + $0x30] sm:$0xff]  ;;  %v214_v35 = vld [vmem:[%s4215_s27 + $0x48] sm:$0xff] }
  0x14   : > { %v257_v33 = vld [vmem:[%s4215_s27 + $0x120] sm:$0xff]  ;;  %v259_v34 = vld [vmem:[%s4215_s27 + $0x130] sm:$0xff]  ;;  %v216_v36 = vld [vmem:[%s4215_s27 + $0x58] sm:$0xff]  ;;  %v239_v40 = vpack.c.bf16 %v211_v32, %v209_v31 }
  0x15   : > { %416 = vmatpush1.bf16.msra.mxu0 %v4086_v3  ;;  %561 = vmatpush1.bf16.msra.mxu1 %v4086_v3  ;;  %v262_v37 = vld [vmem:[%s4215_s27 + $0x148] sm:$0xff]  ;;  %v264_v38 = vld [vmem:[%s4215_s27 + $0x158] sm:$0xff]  ;;  %v287_v41 = vpack.c.bf16 %v259_v34, %v257_v33  ;;  %v242_v42 = vpack.c.bf16 %v216_v36, %v214_v35  ;;  %v4097_v44 = vld [vmem:[%s4829_s2 + $0x20] sm:$0xff]  }
  0x16   : > { %417 = vmatprep.subr.bf16.mxu0 %v4160_v1  ;;  %562 = vmatprep.subr.bf16.mxu1 %v4160_v1  ;;  %v4096_v39 = vld [vmem:[%s4829_s2 + $0x28] sm:$0xff]   ;;  %v290_v43 = vpack.c.bf16 %v264_v38, %v262_v37  ;;  %v213_v45 = vld [vmem:[%s4215_s27 + $0x40] sm:$0xff]  ;;  %v215_v46 = vld [vmem:[%s4215_s27 + $0x50] sm:$0xff] }
  0x17   : > { %v261_v47 = vld [vmem:[%s4215_s27 + $0x140] sm:$0xff]  ;;  %v263_v48 = vld [vmem:[%s4215_s27 + $0x150] sm:$0xff]  ;;  %v218_v49 = vld [vmem:[%s4215_s27 + $0x68] sm:$0xff]  ;;  %v241_v53 = vpack.c.bf16 %v215_v46, %v213_v45 }
  0x18   : > { %v220_v50 = vld [vmem:[%s4215_s27 + $0x78] sm:$0xff]  ;;  %v266_v51 = vld [vmem:[%s4215_s27 + $0x168] sm:$0xff]  ;;  %v289_v54 = vpack.c.bf16 %v263_v48, %v261_v47  ;;  %v217_v57 = vld [vmem:[%s4215_s27 + $0x60] sm:$0xff] }
  0x19   : > { %418 = vmatpush1.bf16.msra.mxu0 %v4087_v4  ;;  %563 = vmatpush1.bf16.msra.mxu1 %v4087_v4  ;;  %v268_v52 = vld [vmem:[%s4215_s27 + $0x178] sm:$0xff]  ;;  %v244_v55 = vpack.c.bf16 %v220_v50, %v218_v49  ;;  %v219_v58 = vld [vmem:[%s4215_s27 + $0x70] sm:$0xff]  ;;  %v265_v59 = vld [vmem:[%s4215_s27 + $0x160] sm:$0xff] }
  0x1a   : > { %419 = vmatprep.subr.bf16.mxu0 %v4160_v1  ;;  %564 = vmatprep.subr.bf16.mxu1 %v4160_v1  ;;  %v292_v56 = vpack.c.bf16 %v268_v52, %v266_v51  ;;  %v267_v60 = vld [vmem:[%s4215_s27 + $0x170] sm:$0xff]  ;;  %v222_v61 = vld [vmem:[%s4215_s27 + $0x88] sm:$0xff]  ;;  %v224_v62 = vld [vmem:[%s4215_s27 + $0x98] sm:$0xff]  ;;  %v322_v52 = vlaneseq }
  0x1b   : > { %v270_v63 = vld [vmem:[%s4215_s27 + $0x188] sm:$0xff]  ;;  %v272_v0 = vld [vmem:[%s4215_s27 + $0x198] sm:$0xff]  ;;  %v291_v2 = vpack.c.bf16 %v267_v60, %v265_v59  ;;  %v246_v3 = vpack.c.bf16 %v224_v62, %v222_v61  ;;  %v221_v5 = vld [vmem:[%s4215_s27 + $0x80] sm:$0xff] }
  0x1c   : > { %v294_v4 = vpack.c.bf16 %v272_v0, %v270_v63  ;;  %v223_v6 = vld [vmem:[%s4215_s27 + $0x90] sm:$0xff]  ;;  %v269_v7 = vld [vmem:[%s4215_s27 + $0x180] sm:$0xff]  ;;  %v226_v9 = vld [vmem:[%s4215_s27 + $0xa8] sm:$0xff] }
  0x1d   : > { %420 = vmatpush1.bf16.msra.mxu0 %v4088_v11  ;;  %565 = vmatpush1.bf16.msra.mxu1 %v4088_v11  ;;  %v271_v8 = vld [vmem:[%s4215_s27 + $0x190] sm:$0xff]  ;;  %v228_v10 = vld [vmem:[%s4215_s27 + $0xb8] sm:$0xff]  ;;  %v274_v11 = vld [vmem:[%s4215_s27 + $0x1a8] sm:$0xff] }
  0x1e   : > { %421 = vmatprep.subr.bf16.mxu0 %v4160_v1  ;;  %566 = vmatprep.subr.bf16.mxu1 %v4160_v1  ;;  %v225_v17 = vld [vmem:[%s4215_s27 + $0xa0] sm:$0xff]  ;;  %v227_v18 = vld [vmem:[%s4215_s27 + $0xb0] sm:$0xff]  ;;  %v230_v21 = vld [vmem:[%s4215_s27 + $0xc8] sm:$0xff] }
  0x1f   : > { %v273_v19 = vld [vmem:[%s4215_s27 + $0x1a0] sm:$0xff]  ;;  %v275_v20 = vld [vmem:[%s4215_s27 + $0x1b0] sm:$0xff]  ;;  %v232_v22 = vld [vmem:[%s4215_s27 + $0xd8] sm:$0xff] }
  0x20   : > { %v278_v23 = vld [vmem:[%s4215_s27 + $0x1c8] sm:$0xff]  ;;  %v280_v24 = vld [vmem:[%s4215_s27 + $0x1d8] sm:$0xff]  ;;  %v277_v31 = vld [vmem:[%s4215_s27 + $0x1c0] sm:$0xff] }
  0x21   : > { %422 = vmatpush1.bf16.msra.mxu0 %v4089_v12  ;;  %567 = vmatpush1.bf16.msra.mxu1 %v4089_v12  ;;  %v276_v12 = vld [vmem:[%s4215_s27 + $0x1b8] sm:$0xff]  ;;  %v279_v32 = vld [vmem:[%s4215_s27 + $0x1d0] sm:$0xff]  ;;  %v234_v33 = vld [vmem:[%s4215_s27 + $0xe8] sm:$0xff] }
  0x22   : > { %423 = vmatprep.subr.bf16.mxu0 %v4160_v1  ;;  %568 = vmatprep.subr.bf16.mxu1 %v4160_v1  ;;  %v236_v34 = vld [vmem:[%s4215_s27 + $0xf8] sm:$0xff]  ;;  %v282_v35 = vld [vmem:[%s4215_s27 + $0x1e8] sm:$0xff]  ;;  %v297_v38 = vpack.c.bf16 %v279_v32, %v277_v31  ;;  %v4099_v48 = vld [vmem:[%s4829_s2 + $0x10] sm:$0xff]  }
  0x23   : > { %v284_v36 = vld [vmem:[%s4215_s27 + $0x1f8] sm:$0xff]  ;;  %v4100_v49 = vld [vmem:[%s4829_s2 + $0x8] sm:$0xff]   ;;  %v4101_v50 = vld [vmem:[%s4829_s2] sm:$0xff]  }
  0x24   : > { %v4098_v47 = vld [vmem:[%s4829_s2 + $0x18] sm:$0xff]   ;;  %v4103_v31 = vld [vmem:[%s4829_s2 + $0x70] sm:$0xff]  }
  0x25   : > { %424 = vmatpush1.bf16.msra.mxu0 %v4090_v13  ;;  %569 = vmatpush1.bf16.msra.mxu1 %v4090_v13  ;;  %v245_v13 = vpack.c.bf16 %v223_v6, %v221_v5  ;;  %v4102_v51 = vld [vmem:[%s4829_s2 + $0x78] sm:$0xff]  }
  0x26   : > { %425 = vmatprep.subr.bf16.mxu0 %v4160_v1  ;;  %570 = vmatprep.subr.bf16.mxu1 %v4160_v1 }
  0x29   : > { %426 = vmatpush1.bf16.msra.mxu0 %v4091_v14  ;;  %571 = vmatpush1.bf16.msra.mxu1 %v4091_v14  ;;  %v293_v14 = vpack.c.bf16 %v271_v8, %v269_v7 }
  0x2a   : > { %439 = vmatprep.subr.bf16.mxu0 %v4160_v1  ;;  %584 = vmatprep.subr.bf16.mxu1 %v4160_v1 }
  0x2d   : > { %440 = vmatpush2.bf16.msra.mxu0 %v4092_v15  ;;  %585 = vmatpush2.bf16.msra.mxu1 %v4092_v15  ;;  %v248_v15 = vpack.c.bf16 %v228_v10, %v226_v9 }
  0x2e   : > { %441 = vmatprep.subr.bf16.mxu0 %v4160_v1  ;;  %586 = vmatprep.subr.bf16.mxu1 %v4160_v1  ;;  %v243_v1 = vpack.c.bf16 %v219_v58, %v217_v57 }
  0x31   : > { %442 = vmatpush2.bf16.msra.mxu0 %v4093_v16  ;;  %587 = vmatpush2.bf16.msra.mxu1 %v4093_v16  ;;  %v296_v16 = vpack.c.bf16 %v276_v12, %v274_v11 }
  0x32   : > { %3627 = vmatprep.subr.bf16.mxu0 %v4094_v25  ;;  %3659 = vmatprep.subr.bf16.mxu1 %v4094_v25 }
  0x34   : > { %444 = vmatmul.mubr.bf16.vlgmr.msra.gmra.mxu0 %v237_v26  ;;  %589 = vmatmul.mubr.bf16.vlgmr.msra.gmra.mxu1 %v285_v27  ;;  %v295_v26 = vpack.c.bf16 %v275_v20, %v273_v19  ;;  %v250_v27 = vpack.c.bf16 %v232_v22, %v230_v21 }
  0x35   : > { %3074 = vmatprep.mubr.msk.bf16.mxu0 %vm386_vm0, %v240_v28  ;;  %3082 = vmatprep.mubr.msk.bf16.mxu1 %vm386_vm0, %v288_v29  ;;  %v298_v28 = vpack.c.bf16 %v280_v24, %v278_v23  ;;  %v229_v29 = vld [vmem:[%s4215_s27 + $0xc0] sm:$0xff] }
  0x36   : > { %3628 = vmatpush3.bf16.msra.mxu0 %v4094_v25  ;;  %3660 = vmatpush3.bf16.msra.mxu1 %v4094_v25  ;;  %v247_v25 = vpack.c.bf16 %v227_v18, %v225_v17 }
  0x37   : > { %3629 = vmatprep.subr.bf16.mxu0 %v4095_v30  ;;  %3661 = vmatprep.subr.bf16.mxu1 %v4095_v30 }
  0x3a   : > { %3630 = vmatpush3.bf16.msra.mxu0 %v4095_v30  ;;  %3662 = vmatpush3.bf16.msra.mxu1 %v4095_v30  ;;  %v231_v30 = vld [vmem:[%s4215_s27 + $0xd0] sm:$0xff] }
  0x3b   : > { %3631 = vmatprep.subr.bf16.mxu0 %v4096_v39  ;;  %3663 = vmatprep.subr.bf16.mxu1 %v4096_v39  ;;  %v249_v37 = vpack.c.bf16 %v231_v30, %v229_v29 }
  0x3c   : > { %452 = vmatmul.mubr.bf16.gmra.mxu0 %v239_v40  ;;  %597 = vmatmul.mubr.bf16.gmra.mxu1 %v287_v41  ;;  %v300_v40 = vpack.c.bf16 %v284_v36, %v282_v35  ;;  %v233_v41 = vld [vmem:[%s4215_s27 + $0xe0] sm:$0xff] }
  0x3d   : > { %3075 = vmatprep.mubr.msk.bf16.mxu0 %vm386_vm0, %v242_v42  ;;  %3083 = vmatprep.mubr.msk.bf16.mxu1 %vm386_vm0, %v290_v43  ;;  %v235_v42 = vld [vmem:[%s4215_s27 + $0xf0] sm:$0xff]  ;;  %v281_v43 = vld [vmem:[%s4215_s27 + $0x1e0] sm:$0xff] }
  0x3e   : > { %3632 = vmatpush3.bf16.msra.mxu0 %v4096_v39  ;;  %3664 = vmatpush3.bf16.msra.mxu1 %v4096_v39  ;;  %v252_v39 = vpack.c.bf16 %v236_v34, %v234_v33  ;;  %v251_v45 = vpack.c.bf16 %v235_v42, %v233_v41 }
  0x3f   : > { %3633 = vmatprep.subr.bf16.mxu0 %v4097_v44  ;;  %3665 = vmatprep.subr.bf16.mxu1 %v4097_v44 }
  0x42   : > { %3634 = vmatpush3.bf16.msra.mxu0 %v4097_v44  ;;  %3666 = vmatpush3.bf16.msra.mxu1 %v4097_v44  ;;  %v283_v44 = vld [vmem:[%s4215_s27 + $0x1f0] sm:$0xff] }
  0x43   : > { %v299_v46 = vpack.c.bf16 %v283_v44, %v281_v43  ;;  %3635 = vmatprep.subr.bf16.mxu0 %v4098_v47  ;;  %3667 = vmatprep.subr.bf16.mxu1 %v4098_v47 }
  0x44   : > { %460 = vmatmul.mubr.bf16.gmra.mxu0 %v241_v53  ;;  %605 = vmatmul.mubr.bf16.gmra.mxu1 %v289_v54  ;;  %v4359_v53 = vshrl.u32 %v322_v52, 7 }
  0x45   : > { %3076 = vmatprep.mubr.msk.bf16.mxu0 %vm386_vm0, %v244_v55  ;;  %3084 = vmatprep.mubr.msk.bf16.mxu1 %vm386_vm0, %v292_v56  ;;  %v4365_v55 = vld [vmem:[%s4830_s3] sm:$0xff] }
  0x46   : > { %3636 = vmatpush3.bf16.msra.mxu0 %v4098_v47  ;;  %3668 = vmatpush3.bf16.msra.mxu1 %v4098_v47  ;;  %v324_v54 = vsub.s32 0, %v4359_v53 }
  0x47   : > { %3637 = vmatprep.subr.bf16.mxu0 %v4099_v48  ;;  %3669 = vmatprep.subr.bf16.mxu1 %v4099_v48 }
  0x48   : > { %v4368_v56 = vrot.slane %v4365_v55, %v324_v54 }
  0x4a   : > { %3638 = vmatpush3.bf16.msra.mxu0 %v4099_v48  ;;  %3670 = vmatpush3.bf16.msra.mxu1 %v4099_v48 }
  0x4b   : > { %3639 = vmatprep.subr.bf16.mxu0 %v4100_v49  ;;  %3671 = vmatprep.subr.bf16.mxu1 %v4100_v49 }
  0x4c   : > { %468 = vmatmul.mubr.bf16.gmra.mxu0 %v243_v1  ;;  %613 = vmatmul.mubr.bf16.gmra.mxu1 %v291_v2 }
  0x4d   : > { %3077 = vmatprep.mubr.msk.bf16.mxu0 %vm386_vm0, %v246_v3  ;;  %3085 = vmatprep.mubr.msk.bf16.mxu1 %vm386_vm0, %v294_v4 }
  0x4e   : > { %3640 = vmatpush3.bf16.msra.mxu0 %v4100_v49  ;;  %3672 = vmatpush3.bf16.msra.mxu1 %v4100_v49 }
  0x4f   : > { %3641 = vmatprep.subr.bf16.mxu0 %v4101_v50  ;;  %3673 = vmatprep.subr.bf16.mxu1 %v4101_v50 }
  0x52   : > { %3642 = vmatpush3.bf16.msra.mxu0 %v4101_v50  ;;  %3674 = vmatpush3.bf16.msra.mxu1 %v4101_v50 }
  0x53   : > { %3691 = vmatprep.subr.bf16.mxu0 %v4102_v51  ;;  %3723 = vmatprep.subr.bf16.mxu1 %v4102_v51 }
  0x54   : > { %476 = vmatmul.mubr.bf16.gmra.mxu0 %v245_v13  ;;  %621 = vmatmul.mubr.bf16.gmra.mxu1 %v293_v14 }
  0x55   : > { %3078 = vmatprep.mubr.msk.bf16.mxu0 %vm386_vm0, %v248_v15  ;;  %3086 = vmatprep.mubr.msk.bf16.mxu1 %vm386_vm0, %v296_v16 }
  0x5c   : > { %484 = vmatmul.mubr.bf16.gmra.mxu0 %v247_v25  ;;  %629 = vmatmul.mubr.bf16.gmra.mxu1 %v295_v26 }
  0x5d   : > { %3079 = vmatprep.mubr.msk.bf16.mxu0 %vm386_vm0, %v250_v27  ;;  %3087 = vmatprep.mubr.msk.bf16.mxu1 %vm386_vm0, %v298_v28 }
  0x64   : > { %492 = vmatmul.mubr.bf16.gmra.mxu0 %v249_v37  ;;  %637 = vmatmul.mubr.bf16.gmra.mxu1 %v297_v38 }
  0x65   : > { %3080 = vmatprep.mubr.msk.bf16.mxu0 %vm386_vm0, %v252_v39  ;;  %3088 = vmatprep.mubr.msk.bf16.mxu1 %vm386_vm0, %v300_v40  ;;  %v4104_v40 = vld [vmem:[%s4829_s2 + $0x68] sm:$0xff]  }
  0x6c   : > { %500 = vmatmul.mubr.bf16.gmra.mxu0 %v251_v45  ;;  %645 = vmatmul.mubr.bf16.gmra.mxu1 %v299_v46 }
  0xf4   : > { %v445_v57 = vpop.f32.mrf.mxu0  ;;  %v590_v58 = vpop.f32.mrf.mxu1 }
  0xf5   : > { %v446_v61 = vadd.f32 %v445_v57, %v4368_v56  ;;  %v591_v62 = vadd.f32 %v590_v58, %v4368_v56 }
  0xf6   : > { %v447_v59 = vpop.f32.mrf.mxu0  ;;  %v592_v60 = vpop.f32.mrf.mxu1 }
  0xf7   : > { %v508_v5 = vmax.f32 %v446_v61, 0.0  ;;  %v653_v6 = vmax.f32 %v591_v62, 0.0 }
  0xf8   : > { %v448_v63 = vpop.f32.mrf.mxu0  ;;  %v593_v0 = vpop.f32.mrf.mxu1 }
  0xf9   : > { %v449_v1 = vadd.f32 %v448_v63, %v4368_v56  ;;  %v594_v2 = vadd.f32 %v593_v0, %v4368_v56  ;;  %v4106_v63 = vld [vmem:[%s4829_s2 + $0x58] sm:$0xff]  }
  0xfa   : > { %v450_v3 = vpop.f32.mrf.mxu0  ;;  %v595_v4 = vpop.f32.mrf.mxu1 }
  0xfb   : > { %v509_v7 = vmax.f32 %v449_v1, 0.0  ;;  %v654_v8 = vmax.f32 %v594_v2, 0.0 }
  0xfc   : > { %v453_v9 = vpop.f32.mrf.mxu0  ;;  %v598_v10 = vpop.f32.mrf.mxu1 }
  0xfd   : > { %v524_v11 = vpack.c.bf16 %v509_v7, %v508_v5  ;;  %v669_v12 = vpack.c.bf16 %v654_v8, %v653_v6  ;;  %v454_v15 = vadd.f32 %v453_v9, %v4368_v56  ;;  %v599_v16 = vadd.f32 %v598_v10, %v4368_v56 }
  0xfe   : > { %v455_v13 = vpop.f32.mrf.mxu0  ;;  %v600_v14 = vpop.f32.mrf.mxu1 }
  0xff   : > { %3643 = vmatprep.mubr.bf16.mxu0 %v524_v11  ;;  %3675 = vmatprep.mubr.bf16.mxu1 %v669_v12  ;;  %v510_v23 = vmax.f32 %v454_v15, 0.0  ;;  %v655_v24 = vmax.f32 %v599_v16, 0.0 }
 0x100   : > { %v456_v17 = vpop.f32.mrf.mxu0  ;;  %v601_v18 = vpop.f32.mrf.mxu1 }
 0x101   : > { %v457_v19 = vadd.f32 %v456_v17, %v4368_v56  ;;  %v602_v20 = vadd.f32 %v601_v18, %v4368_v56 }
 0x102   : > { %v458_v21 = vpop.f32.mrf.mxu0  ;;  %v603_v22 = vpop.f32.mrf.mxu1 }
 0x103   : > { %v511_v25 = vmax.f32 %v457_v19, 0.0  ;;  %v656_v26 = vmax.f32 %v602_v20, 0.0 }
 0x104   : > { %v461_v27 = vpop.f32.mrf.mxu0  ;;  %v606_v28 = vpop.f32.mrf.mxu1 }
 0x105   : > { %v525_v29 = vpack.c.bf16 %v511_v25, %v510_v23  ;;  %v670_v30 = vpack.c.bf16 %v656_v26, %v655_v24  ;;  %v462_v34 = vadd.f32 %v461_v27, %v4368_v56  ;;  %v607_v35 = vadd.f32 %v606_v28, %v4368_v56 }
 0x106   : > { %v463_v32 = vpop.f32.mrf.mxu0  ;;  %v608_v33 = vpop.f32.mrf.mxu1 }
 0x107   : > { %3644 = vmatmul.mubr.bf16.vlgmr.msra.gmra.mxu0 %v525_v29  ;;  %3676 = vmatmul.mubr.bf16.vlgmr.msra.gmra.mxu1 %v670_v30  ;;  %v512_v43 = vmax.f32 %v462_v34, 0.0  ;;  %v657_v44 = vmax.f32 %v607_v35, 0.0 }
 0x108   : > { %v464_v36 = vpop.f32.mrf.mxu0  ;;  %v609_v37 = vpop.f32.mrf.mxu1  ;;  %3692 = vmatpush3.bf16.msra.mxu0 %v4102_v51  ;;  %3724 = vmatpush3.bf16.msra.mxu1 %v4102_v51  ;;  %v4105_v51 = vld [vmem:[%s4829_s2 + $0x60] sm:$0xff]  }
 0x109   : > { %v465_v38 = vadd.f32 %v464_v36, %v4368_v56  ;;  %v610_v39 = vadd.f32 %v609_v37, %v4368_v56  ;;  %3693 = vmatprep.subr.bf16.mxu0 %v4103_v31  ;;  %3725 = vmatprep.subr.bf16.mxu1 %v4103_v31 }
 0x10a   : > { %v466_v41 = vpop.f32.mrf.mxu0  ;;  %v611_v42 = vpop.f32.mrf.mxu1 }
 0x10b   : > { %v513_v45 = vmax.f32 %v465_v38, 0.0  ;;  %v658_v46 = vmax.f32 %v610_v39, 0.0 }
 0x10c   : > { %v469_v47 = vpop.f32.mrf.mxu0  ;;  %v614_v48 = vpop.f32.mrf.mxu1  ;;  %3694 = vmatpush3.bf16.msra.mxu0 %v4103_v31  ;;  %3726 = vmatpush3.bf16.msra.mxu1 %v4103_v31 }
 0x10d   : > { %v526_v49 = vpack.c.bf16 %v513_v45, %v512_v43  ;;  %v671_v50 = vpack.c.bf16 %v658_v46, %v657_v44  ;;  %3695 = vmatprep.subr.bf16.mxu0 %v4104_v40  ;;  %3727 = vmatprep.subr.bf16.mxu1 %v4104_v40  ;;  %v470_v57 = vadd.f32 %v469_v47, %v4368_v56 }
 0x10e   : > { %v471_v52 = vpop.f32.mrf.mxu0  ;;  %v616_v54 = vpop.f32.mrf.mxu1  ;;  %v615_v58 = vadd.f32 %v614_v48, %v4368_v56 }
 0x10f   : > { %3647 = vmatprep.mubr.bf16.mxu0 %v526_v49  ;;  %3679 = vmatprep.mubr.bf16.mxu1 %v671_v50  ;;  %v514_v2 = vmax.f32 %v470_v57, 0.0 }
 0x110   : > { %v472_v59 = vpop.f32.mrf.mxu0  ;;  %v617_v60 = vpop.f32.mrf.mxu1  ;;  %3696 = vmatpush3.bf16.msra.mxu0 %v4104_v40  ;;  %3728 = vmatpush3.bf16.msra.mxu1 %v4104_v40  ;;  %v659_v3 = vmax.f32 %v615_v58, 0.0 }
 0x111   : > { %v473_v61 = vadd.f32 %v472_v59, %v4368_v56  ;;  %v618_v62 = vadd.f32 %v617_v60, %v4368_v56  ;;  %3697 = vmatprep.subr.bf16.mxu0 %v4105_v51  ;;  %3729 = vmatprep.subr.bf16.mxu1 %v4105_v51 }
 0x112   : > { %v474_v0 = vpop.f32.mrf.mxu0  ;;  %v619_v1 = vpop.f32.mrf.mxu1 }
 0x113   : > { %v515_v4 = vmax.f32 %v473_v61, 0.0  ;;  %v660_v5 = vmax.f32 %v618_v62, 0.0 }
 0x114   : > { %v477_v6 = vpop.f32.mrf.mxu0  ;;  %v622_v7 = vpop.f32.mrf.mxu1  ;;  %3698 = vmatpush3.bf16.msra.mxu0 %v4105_v51  ;;  %3730 = vmatpush3.bf16.msra.mxu1 %v4105_v51 }
 0x115   : > { %v527_v8 = vpack.c.bf16 %v515_v4, %v514_v2  ;;  %v672_v9 = vpack.c.bf16 %v660_v5, %v659_v3  ;;  %3699 = vmatprep.subr.bf16.mxu0 %v4106_v63  ;;  %3731 = vmatprep.subr.bf16.mxu1 %v4106_v63  ;;  %v478_v12 = vadd.f32 %v477_v6, %v4368_v56 }
 0x116   : > { %v479_v10 = vpop.f32.mrf.mxu0  ;;  %v624_v11 = vpop.f32.mrf.mxu1  ;;  %v623_v13 = vadd.f32 %v622_v7, %v4368_v56 }
 0x117   : > { %3648 = vmatmul.mubr.bf16.gmra.mxu0 %v527_v8  ;;  %3680 = vmatmul.mubr.bf16.gmra.mxu1 %v672_v9  ;;  %v516_v20 = vmax.f32 %v478_v12, 0.0 }
 0x118   : > { %v480_v14 = vpop.f32.mrf.mxu0  ;;  %v625_v15 = vpop.f32.mrf.mxu1  ;;  %3700 = vmatpush3.bf16.msra.mxu0 %v4106_v63  ;;  %3732 = vmatpush3.bf16.msra.mxu1 %v4106_v63  ;;  %v661_v21 = vmax.f32 %v623_v13, 0.0 }
 0x119   : > { %v481_v16 = vadd.f32 %v480_v14, %v4368_v56  ;;  %v626_v17 = vadd.f32 %v625_v15, %v4368_v56 }
 0x11a   : > { %v482_v18 = vpop.f32.mrf.mxu0  ;;  %v627_v19 = vpop.f32.mrf.mxu1 }
 0x11b   : > { %v517_v22 = vmax.f32 %v481_v16, 0.0  ;;  %v662_v23 = vmax.f32 %v626_v17, 0.0  ;;  %v4107_v19 = vld [vmem:[%s4829_s2 + $0x50] sm:$0xff]  }
 0x11c   : > { %v485_v24 = vpop.f32.mrf.mxu0  ;;  %v630_v25 = vpop.f32.mrf.mxu1  ;;  %3701 = vmatprep.subr.bf16.mxu0 %v4107_v19  ;;  %3733 = vmatprep.subr.bf16.mxu1 %v4107_v19 }
 0x11d   : > { %v528_v26 = vpack.c.bf16 %v517_v22, %v516_v20  ;;  %v673_v27 = vpack.c.bf16 %v662_v23, %v661_v21  ;;  %v486_v30 = vadd.f32 %v485_v24, %v4368_v56  ;;  %v631_v31 = vadd.f32 %v630_v25, %v4368_v56  ;;  %3702 = vmatpush3.bf16.msra.mxu0 %v4107_v19  ;;  %v4109_v20 = vld [vmem:[%s4829_s2 + $0x40] sm:$0xff]   ;;  %v4110_v21 = vld [vmem:[%s4829_s2 + $0xb8] sm:$0xff]  }
 0x11e   : > { %v487_v28 = vpop.f32.mrf.mxu0  ;;  %v632_v29 = vpop.f32.mrf.mxu1  ;;  %3734 = vmatpush3.bf16.msra.mxu1 %v4107_v19  ;;  %v695_v22 = vsub.s32 1, %v4359_v53 }
 0x11f   : > { %3651 = vmatprep.mubr.bf16.mxu0 %v528_v26  ;;  %3683 = vmatprep.mubr.bf16.mxu1 %v673_v27  ;;  %v518_v38 = vmax.f32 %v486_v30, 0.0  ;;  %v663_v39 = vmax.f32 %v631_v31, 0.0 }
 0x120   : > { %v488_v32 = vpop.f32.mrf.mxu0  ;;  %v633_v33 = vpop.f32.mrf.mxu1  ;;  %v4428_v25 = vrot.slane %v4365_v55, %v695_v22 }
 0x121   : > { %v489_v34 = vadd.f32 %v488_v32, %v4368_v56  ;;  %v634_v35 = vadd.f32 %v633_v33, %v4368_v56 }
 0x122   : > { %v490_v36 = vpop.f32.mrf.mxu0  ;;  %v635_v37 = vpop.f32.mrf.mxu1 }
 0x123   : > { %v519_v40 = vmax.f32 %v489_v34, 0.0  ;;  %v664_v41 = vmax.f32 %v634_v35, 0.0 }
 0x124   : > { %v493_v42 = vpop.f32.mrf.mxu0  ;;  %v638_v43 = vpop.f32.mrf.mxu1 }
 0x125   : > { %v529_v44 = vpack.c.bf16 %v519_v40, %v518_v38  ;;  %v674_v45 = vpack.c.bf16 %v664_v41, %v663_v39  ;;  %v494_v48 = vadd.f32 %v493_v42, %v4368_v56  ;;  %v639_v49 = vadd.f32 %v638_v43, %v4368_v56 }
 0x126   : > { %v495_v46 = vpop.f32.mrf.mxu0  ;;  %v640_v47 = vpop.f32.mrf.mxu1 }
 0x127   : > { %3652 = vmatmul.mubr.bf16.gmra.mxu0 %v529_v44  ;;  %3684 = vmatmul.mubr.bf16.gmra.mxu1 %v674_v45  ;;  %v520_v59 = vmax.f32 %v494_v48, 0.0  ;;  %v665_v60 = vmax.f32 %v639_v49, 0.0 }
 0x128   : > { %v496_v50 = vpop.f32.mrf.mxu0  ;;  %v641_v51 = vpop.f32.mrf.mxu1 }
 0x129   : > { %v497_v52 = vadd.f32 %v496_v50, %v4368_v56  ;;  %v642_v54 = vadd.f32 %v641_v51, %v4368_v56 }
 0x12a   : > { %v498_v57 = vpop.f32.mrf.mxu0  ;;  %v643_v58 = vpop.f32.mrf.mxu1 }
 0x12b   : > { %v521_v61 = vmax.f32 %v497_v52, 0.0  ;;  %v666_v62 = vmax.f32 %v642_v54, 0.0  ;;  %v4111_v52 = vld [vmem:[%s4829_s2 + $0xb0] sm:$0xff]   ;;  %v4112_v58 = vld [vmem:[%s4829_s2 + $0xa8] sm:$0xff]  }
 0x12c   : > { %v501_v63 = vpop.f32.mrf.mxu0  ;;  %v646_v0 = vpop.f32.mrf.mxu1 }
 0x12d   : > { %v530_v1 = vpack.c.bf16 %v521_v61, %v520_v59  ;;  %v675_v2 = vpack.c.bf16 %v666_v62, %v665_v60  ;;  %v502_v5 = vadd.f32 %v501_v63, %v4368_v56  ;;  %v647_v6 = vadd.f32 %v646_v0, %v4368_v56  ;;  %v4113_v63 = vld [vmem:[%s4829_s2 + $0xa0] sm:$0xff]  }
 0x12e   : > { %v503_v3 = vpop.f32.mrf.mxu0  ;;  %v648_v4 = vpop.f32.mrf.mxu1 }
 0x12f   : > { %3655 = vmatprep.mubr.bf16.mxu0 %v530_v1  ;;  %3687 = vmatprep.mubr.bf16.mxu1 %v675_v2  ;;  %v522_v13 = vmax.f32 %v502_v5, 0.0  ;;  %v667_v14 = vmax.f32 %v647_v6, 0.0 }
 0x130   : > { %v504_v7 = vpop.f32.mrf.mxu0  ;;  %v649_v8 = vpop.f32.mrf.mxu1 }
 0x131   : > { %v505_v9 = vadd.f32 %v504_v7, %v4368_v56  ;;  %v650_v10 = vadd.f32 %v649_v8, %v4368_v56  ;;  %v4108_v56 = vld [vmem:[%s4829_s2 + $0x48] sm:$0xff]  }
 0x132   : > { %v506_v11 = vpop.f32.mrf.mxu0  ;;  %v651_v12 = vpop.f32.mrf.mxu1  ;;  %3703 = vmatprep.subr.bf16.mxu0 %v4108_v56  ;;  %3735 = vmatprep.subr.bf16.mxu1 %v4108_v56 }
 0x133   : > { %v523_v15 = vmax.f32 %v505_v9, 0.0  ;;  %v668_v16 = vmax.f32 %v650_v10, 0.0  ;;  %3704 = vmatpush3.bf16.msra.mxu0 %v4108_v56  ;;  %3736 = vmatpush3.bf16.msra.mxu1 %v4108_v56  ;;  %v4114_v12 = vld [vmem:[%s4829_s2 + $0x98] sm:$0xff]  }
 0x134   : > { %3705 = vmatprep.subr.bf16.mxu0 %v4109_v20  ;;  %3737 = vmatprep.subr.bf16.mxu1 %v4109_v20 }
 0x135   : > { %v531_v17 = vpack.c.bf16 %v523_v15, %v522_v13  ;;  %v676_v18 = vpack.c.bf16 %v668_v16, %v667_v14 }
 0x137   : > { %3656 = vmatmul.mubr.bf16.gmra.mxu0 %v531_v17  ;;  %3688 = vmatmul.mubr.bf16.gmra.mxu1 %v676_v18 }
 0x138   : > { %3706 = vmatpush3.bf16.msra.mxu0 %v4109_v20  ;;  %3738 = vmatpush3.bf16.msra.mxu1 %v4109_v20 }
 0x139   : > { %3755 = vmatprep.subr.bf16.mxu0 %v4110_v21  ;;  %3787 = vmatprep.subr.bf16.mxu1 %v4110_v21 }
 0x1c7   : > { %v3645_v23 = vpop.f32.mrf.mxu0  ;;  %v3677_v24 = vpop.f32.mrf.mxu1 }
 0x1c8   : > { %v788_v34 = vadd.f32 %v3645_v23, %v4428_v25  ;;  %v909_v35 = vadd.f32 %v3677_v24, %v4428_v25 }
 0x1c9   : > { %v779_v26 = vpop.f32.mrf.mxu0  ;;  %v900_v27 = vpop.f32.mrf.mxu1 }
 0x1ca   : > { %v780_v30 = vadd.f32 %v779_v26, %v4428_v25  ;;  %v901_v31 = vadd.f32 %v900_v27, %v4428_v25  ;;  %v844_v46 = vmax.f32 %v788_v34, 0.0  ;;  %v965_v47 = vmax.f32 %v909_v35, 0.0 }
 0x1cb   : > { %v3646_v28 = vpop.f32.mrf.mxu0  ;;  %v3678_v29 = vpop.f32.mrf.mxu1 }
 0x1cc   : > { %v791_v32 = vadd.f32 %v3646_v28, %v4428_v25  ;;  %v912_v33 = vadd.f32 %v3678_v29, %v4428_v25  ;;  %v842_v42 = vmax.f32 %v780_v30, 0.0  ;;  %v963_v43 = vmax.f32 %v901_v31, 0.0 }
 0x1cd   : > { %v782_v36 = vpop.f32.mrf.mxu0  ;;  %v903_v37 = vpop.f32.mrf.mxu1 }
 0x1ce   : > { %v783_v38 = vadd.f32 %v782_v36, %v4428_v25  ;;  %v904_v39 = vadd.f32 %v903_v37, %v4428_v25  ;;  %v845_v40 = vmax.f32 %v791_v32, 0.0  ;;  %v966_v41 = vmax.f32 %v912_v33, 0.0 }
 0x1d0   : > { %v843_v44 = vmax.f32 %v783_v38, 0.0  ;;  %v964_v45 = vmax.f32 %v904_v39, 0.0  ;;  %v859_v50 = vpack.c.bf16 %v845_v40, %v844_v46  ;;  %v980_v51 = vpack.c.bf16 %v966_v41, %v965_v47 }
 0x1d2   : > { %v858_v48 = vpack.c.bf16 %v843_v44, %v842_v42  ;;  %v979_v49 = vpack.c.bf16 %v964_v45, %v963_v43 }
 0x1d4   : > { %3707 = vmatprep.mubr.bf16.mxu0 %v858_v48  ;;  %3739 = vmatprep.mubr.bf16.mxu1 %v979_v49 }
 0x1d5   : > { %3708 = vmatmul.mubr.bf16.vlgmr.msra.gmra.mxu0 %v859_v50  ;;  %3740 = vmatmul.mubr.bf16.vlgmr.msra.gmra.mxu1 %v980_v51 }
 0x1d6   : > { %3756 = vmatpush3.bf16.msra.mxu0 %v4110_v21  ;;  %3788 = vmatpush3.bf16.msra.mxu1 %v4110_v21 }
 0x1d7   : > { %v3649_v54 = vpop.f32.mrf.mxu0  ;;  %v3681_v57 = vpop.f32.mrf.mxu1  ;;  %3757 = vmatprep.subr.bf16.mxu0 %v4111_v52  ;;  %3789 = vmatprep.subr.bf16.mxu1 %v4111_v52 }
 0x1d8   : > { %v804_v4 = vadd.f32 %v3649_v54, %v4428_v25  ;;  %v925_v5 = vadd.f32 %v3681_v57, %v4428_v25 }
 0x1d9   : > { %v795_v59 = vpop.f32.mrf.mxu0  ;;  %v916_v60 = vpop.f32.mrf.mxu1 }
 0x1da   : > { %3758 = vmatpush3.bf16.msra.mxu0 %v4111_v52  ;;  %3790 = vmatpush3.bf16.msra.mxu1 %v4111_v52  ;;  %v796_v0 = vadd.f32 %v795_v59, %v4428_v25  ;;  %v917_v1 = vadd.f32 %v916_v60, %v4428_v25  ;;  %v848_v17 = vmax.f32 %v804_v4, 0.0  ;;  %v969_v18 = vmax.f32 %v925_v5, 0.0 }
 0x1db   : > { %v3650_v61 = vpop.f32.mrf.mxu0  ;;  %v3682_v62 = vpop.f32.mrf.mxu1  ;;  %3759 = vmatprep.subr.bf16.mxu0 %v4112_v58  ;;  %3791 = vmatprep.subr.bf16.mxu1 %v4112_v58 }
 0x1dc   : > { %v807_v2 = vadd.f32 %v3650_v61, %v4428_v25  ;;  %v928_v3 = vadd.f32 %v3682_v62, %v4428_v25  ;;  %v846_v13 = vmax.f32 %v796_v0, 0.0  ;;  %v967_v14 = vmax.f32 %v917_v1, 0.0 }
 0x1dd   : > { %v798_v6 = vpop.f32.mrf.mxu0  ;;  %v919_v7 = vpop.f32.mrf.mxu1 }
 0x1de   : > { %v799_v8 = vadd.f32 %v798_v6, %v4428_v25  ;;  %v920_v9 = vadd.f32 %v919_v7, %v4428_v25  ;;  %3760 = vmatpush3.bf16.msra.mxu0 %v4112_v58  ;;  %3792 = vmatpush3.bf16.msra.mxu1 %v4112_v58  ;;  %v849_v10 = vmax.f32 %v807_v2, 0.0  ;;  %v970_v11 = vmax.f32 %v928_v3, 0.0 }
 0x1df   : > { %3761 = vmatprep.subr.bf16.mxu0 %v4113_v63  ;;  %3793 = vmatprep.subr.bf16.mxu1 %v4113_v63 }
 0x1e0   : > { %v847_v15 = vmax.f32 %v799_v8, 0.0  ;;  %v968_v16 = vmax.f32 %v920_v9, 0.0  ;;  %v861_v20 = vpack.c.bf16 %v849_v10, %v848_v17  ;;  %v982_v21 = vpack.c.bf16 %v970_v11, %v969_v18  ;;  %v4116_v18 = vld [vmem:[%s4829_s2 + $0x88] sm:$0xff]  }
 0x1e2   : > { %v860_v19 = vpack.c.bf16 %v847_v15, %v846_v13  ;;  %v981_v56 = vpack.c.bf16 %v968_v16, %v967_v14  ;;  %3762 = vmatpush3.bf16.msra.mxu0 %v4113_v63  ;;  %3794 = vmatpush3.bf16.msra.mxu1 %v4113_v63 }
 0x1e3   : > { %3763 = vmatprep.subr.bf16.mxu0 %v4114_v12  ;;  %3795 = vmatprep.subr.bf16.mxu1 %v4114_v12 }
 0x1e4   : > { %3711 = vmatprep.mubr.bf16.mxu0 %v860_v19  ;;  %3743 = vmatprep.mubr.bf16.mxu1 %v981_v56  ;;  %v4117_v19 = vld [vmem:[%s4829_s2 + $0x80] sm:$0xff]   ;;  %v4118_v56 = vld [vmem:[%s4829_s2 + $0xf8] sm:$0xff]  }
 0x1e5   : > { %3712 = vmatmul.mubr.bf16.gmra.mxu0 %v861_v20  ;;  %3744 = vmatmul.mubr.bf16.gmra.mxu1 %v982_v21  ;;  %v1006_v20 = vsub.s32 2, %v4359_v53 }
 0x1e6   : > { %3764 = vmatpush3.bf16.msra.mxu0 %v4114_v12  ;;  %3796 = vmatpush3.bf16.msra.mxu1 %v4114_v12 }
 0x1e7   : > { %v3653_v22 = vpop.f32.mrf.mxu0  ;;  %v3685_v23 = vpop.f32.mrf.mxu1 }
 0x1e8   : > { %v820_v33 = vadd.f32 %v3653_v22, %v4428_v25  ;;  %v941_v34 = vadd.f32 %v3685_v23, %v4428_v25  ;;  %v4488_v23 = vrot.slane %v4365_v55, %v1006_v20 }
 0x1e9   : > { %v811_v24 = vpop.f32.mrf.mxu0  ;;  %v932_v26 = vpop.f32.mrf.mxu1 }
 0x1ea   : > { %v812_v29 = vadd.f32 %v811_v24, %v4428_v25  ;;  %v933_v30 = vadd.f32 %v932_v26, %v4428_v25  ;;  %v852_v45 = vmax.f32 %v820_v33, 0.0  ;;  %v973_v46 = vmax.f32 %v941_v34, 0.0 }
 0x1eb   : > { %v3654_v27 = vpop.f32.mrf.mxu0  ;;  %v3686_v28 = vpop.f32.mrf.mxu1 }
 0x1ec   : > { %v823_v31 = vadd.f32 %v3654_v27, %v4428_v25  ;;  %v944_v32 = vadd.f32 %v3686_v28, %v4428_v25  ;;  %v850_v41 = vmax.f32 %v812_v29, 0.0  ;;  %v971_v42 = vmax.f32 %v933_v30, 0.0 }
 0x1ed   : > { %v814_v35 = vpop.f32.mrf.mxu0  ;;  %v935_v36 = vpop.f32.mrf.mxu1 }
 0x1ee   : > { %v815_v37 = vadd.f32 %v814_v35, %v4428_v25  ;;  %v936_v38 = vadd.f32 %v935_v36, %v4428_v25  ;;  %v853_v39 = vmax.f32 %v823_v31, 0.0  ;;  %v974_v40 = vmax.f32 %v944_v32, 0.0 }
 0x1f0   : > { %v851_v43 = vmax.f32 %v815_v37, 0.0  ;;  %v972_v44 = vmax.f32 %v936_v38, 0.0  ;;  %v863_v49 = vpack.c.bf16 %v853_v39, %v852_v45  ;;  %v984_v50 = vpack.c.bf16 %v974_v40, %v973_v46 }
 0x1f2   : > { %v862_v47 = vpack.c.bf16 %v851_v43, %v850_v41  ;;  %v983_v48 = vpack.c.bf16 %v972_v44, %v971_v42 }
 0x1f4   : > { %3715 = vmatprep.mubr.bf16.mxu0 %v862_v47  ;;  %3747 = vmatprep.mubr.bf16.mxu1 %v983_v48 }
 0x1f5   : > { %3716 = vmatmul.mubr.bf16.gmra.mxu0 %v863_v49  ;;  %3748 = vmatmul.mubr.bf16.gmra.mxu1 %v984_v50  ;;  %v4119_v50 = vld [vmem:[%s4829_s2 + $0xf0] sm:$0xff]  }
 0x1f7   : > { %v3657_v51 = vpop.f32.mrf.mxu0  ;;  %v3689_v52 = vpop.f32.mrf.mxu1 }
 0x1f8   : > { %v836_v0 = vadd.f32 %v3657_v51, %v4428_v25  ;;  %v957_v1 = vadd.f32 %v3689_v52, %v4428_v25 }
 0x1f9   : > { %v827_v54 = vpop.f32.mrf.mxu0  ;;  %v948_v57 = vpop.f32.mrf.mxu1 }
 0x1fa   : > { %v828_v60 = vadd.f32 %v827_v54, %v4428_v25  ;;  %v949_v61 = vadd.f32 %v948_v57, %v4428_v25  ;;  %v856_v12 = vmax.f32 %v836_v0, 0.0  ;;  %v977_v13 = vmax.f32 %v957_v1, 0.0  ;;  %v4120_v54 = vld [vmem:[%s4829_s2 + $0xe8] sm:$0xff]  }
 0x1fb   : > { %v3658_v58 = vpop.f32.mrf.mxu0  ;;  %v3690_v59 = vpop.f32.mrf.mxu1 }
 0x1fc   : > { %v839_v62 = vadd.f32 %v3658_v58, %v4428_v25  ;;  %v960_v63 = vadd.f32 %v3690_v59, %v4428_v25  ;;  %v854_v8 = vmax.f32 %v828_v60, 0.0  ;;  %v975_v9 = vmax.f32 %v949_v61, 0.0  ;;  %v4121_v61 = vld [vmem:[%s4829_s2 + $0xe0] sm:$0xff]  }
 0x1fd   : > { %v830_v2 = vpop.f32.mrf.mxu0  ;;  %v951_v3 = vpop.f32.mrf.mxu1 }
 0x1fe   : > { %v831_v4 = vadd.f32 %v830_v2, %v4428_v25  ;;  %v952_v5 = vadd.f32 %v951_v3, %v4428_v25  ;;  %v857_v6 = vmax.f32 %v839_v62, 0.0  ;;  %v978_v7 = vmax.f32 %v960_v63, 0.0  ;;  %v4115_v25 = vld [vmem:[%s4829_s2 + $0x90] sm:$0xff]  }
 0x1ff   : > { %3765 = vmatprep.subr.bf16.mxu0 %v4115_v25  ;;  %3797 = vmatprep.subr.bf16.mxu1 %v4115_v25 }
 0x200   : > { %v855_v10 = vmax.f32 %v831_v4, 0.0  ;;  %v976_v11 = vmax.f32 %v952_v5, 0.0  ;;  %v865_v16 = vpack.c.bf16 %v857_v6, %v856_v12  ;;  %v986_v17 = vpack.c.bf16 %v978_v7, %v977_v13  ;;  %3766 = vmatpush3.bf16.msra.mxu0 %v4115_v25  ;;  %3798 = vmatpush3.bf16.msra.mxu1 %v4115_v25 }
 0x201   : > { %3767 = vmatprep.subr.bf16.mxu0 %v4116_v18  ;;  %3799 = vmatprep.subr.bf16.mxu1 %v4116_v18 }
 0x202   : > { %v864_v14 = vpack.c.bf16 %v855_v10, %v854_v8  ;;  %v985_v15 = vpack.c.bf16 %v976_v11, %v975_v9  ;;  %v4122_v10 = vld [vmem:[%s4829_s2 + $0xd8] sm:$0xff]  }
 0x204   : > { %3719 = vmatprep.mubr.bf16.mxu0 %v864_v14  ;;  %3751 = vmatprep.mubr.bf16.mxu1 %v985_v15 }
 0x205   : > { %3720 = vmatmul.mubr.bf16.gmra.mxu0 %v865_v16  ;;  %3752 = vmatmul.mubr.bf16.gmra.mxu1 %v986_v17 }
 0x206   : > { %3768 = vmatpush3.bf16.msra.mxu0 %v4116_v18  ;;  %3800 = vmatpush3.bf16.msra.mxu1 %v4116_v18 }
 0x207   : > { %3769 = vmatprep.subr.bf16.mxu0 %v4117_v19  ;;  %3801 = vmatprep.subr.bf16.mxu1 %v4117_v19 }
 0x20a   : > { %3770 = vmatpush3.bf16.msra.mxu0 %v4117_v19  ;;  %3802 = vmatpush3.bf16.msra.mxu1 %v4117_v19 }
 0x20b   : > { %3819 = vmatprep.subr.bf16.mxu0 %v4118_v56  ;;  %3851 = vmatprep.subr.bf16.mxu1 %v4118_v56 }
 0x295   : > { %v3709_v21 = vpop.f32.mrf.mxu0  ;;  %v3741_v22 = vpop.f32.mrf.mxu1 }
 0x296   : > { %v1099_v33 = vadd.f32 %v3709_v21, %v4488_v23  ;;  %v1220_v34 = vadd.f32 %v3741_v22, %v4488_v23 }
 0x297   : > { %v1090_v24 = vpop.f32.mrf.mxu0  ;;  %v1211_v26 = vpop.f32.mrf.mxu1 }
 0x298   : > { %v1091_v29 = vadd.f32 %v1090_v24, %v4488_v23  ;;  %v1212_v30 = vadd.f32 %v1211_v26, %v4488_v23  ;;  %v1155_v44 = vmax.f32 %v1099_v33, 0.0  ;;  %v1276_v45 = vmax.f32 %v1220_v34, 0.0 }
 0x299   : > { %v3710_v27 = vpop.f32.mrf.mxu0  ;;  %v3742_v28 = vpop.f32.mrf.mxu1 }
 0x29a   : > { %v1102_v31 = vadd.f32 %v3710_v27, %v4488_v23  ;;  %v1223_v32 = vadd.f32 %v3742_v28, %v4488_v23  ;;  %v1153_v40 = vmax.f32 %v1091_v29, 0.0  ;;  %v1274_v41 = vmax.f32 %v1212_v30, 0.0 }
 0x29b   : > { %v1093_v35 = vpop.f32.mrf.mxu0  ;;  %v1214_v36 = vpop.f32.mrf.mxu1 }
 0x29c   : > { %v1094_v55 = vadd.f32 %v1093_v35, %v4488_v23  ;;  %v1215_v37 = vadd.f32 %v1214_v36, %v4488_v23  ;;  %v1156_v38 = vmax.f32 %v1102_v31, 0.0  ;;  %v1277_v39 = vmax.f32 %v1223_v32, 0.0 }
 0x29e   : > { %v1154_v42 = vmax.f32 %v1094_v55, 0.0  ;;  %v1275_v43 = vmax.f32 %v1215_v37, 0.0  ;;  %v1170_v48 = vpack.c.bf16 %v1156_v38, %v1155_v44  ;;  %v1291_v49 = vpack.c.bf16 %v1277_v39, %v1276_v45 }
 0x2a0   : > { %v1169_v46 = vpack.c.bf16 %v1154_v42, %v1153_v40  ;;  %v1290_v47 = vpack.c.bf16 %v1275_v43, %v1274_v41 }
 0x2a2   : > { %3771 = vmatprep.mubr.bf16.mxu0 %v1169_v46  ;;  %3803 = vmatprep.mubr.bf16.mxu1 %v1290_v47 }
 0x2a3   : > { %3772 = vmatmul.mubr.bf16.vlgmr.msra.gmra.mxu0 %v1170_v48  ;;  %3804 = vmatmul.mubr.bf16.vlgmr.msra.gmra.mxu1 %v1291_v49 }
 0x2a4   : > { %3820 = vmatpush3.bf16.msra.mxu0 %v4118_v56  ;;  %3852 = vmatpush3.bf16.msra.mxu1 %v4118_v56 }
 0x2a5   : > { %v3713_v51 = vpop.f32.mrf.mxu0  ;;  %v3745_v52 = vpop.f32.mrf.mxu1  ;;  %3821 = vmatprep.subr.bf16.mxu0 %v4119_v50  ;;  %3853 = vmatprep.subr.bf16.mxu1 %v4119_v50 }
 0x2a6   : > { %v1115_v2 = vadd.f32 %v3713_v51, %v4488_v23  ;;  %v1236_v3 = vadd.f32 %v3745_v52, %v4488_v23 }
 0x2a7   : > { %v1106_v57 = vpop.f32.mrf.mxu0  ;;  %v1227_v58 = vpop.f32.mrf.mxu1 }
 0x2a8   : > { %3822 = vmatpush3.bf16.msra.mxu0 %v4119_v50  ;;  %3854 = vmatpush3.bf16.msra.mxu1 %v4119_v50  ;;  %v1107_v62 = vadd.f32 %v1106_v57, %v4488_v23  ;;  %v1228_v63 = vadd.f32 %v1227_v58, %v4488_v23  ;;  %v1159_v15 = vmax.f32 %v1115_v2, 0.0  ;;  %v1280_v16 = vmax.f32 %v1236_v3, 0.0 }
 0x2a9   : > { %v3714_v59 = vpop.f32.mrf.mxu0  ;;  %v3746_v60 = vpop.f32.mrf.mxu1  ;;  %3823 = vmatprep.subr.bf16.mxu0 %v4120_v54  ;;  %3855 = vmatprep.subr.bf16.mxu1 %v4120_v54 }
 0x2aa   : > { %v1118_v0 = vadd.f32 %v3714_v59, %v4488_v23  ;;  %v1239_v1 = vadd.f32 %v3746_v60, %v4488_v23  ;;  %v1157_v11 = vmax.f32 %v1107_v62, 0.0  ;;  %v1278_v12 = vmax.f32 %v1228_v63, 0.0 }
 0x2ab   : > { %v1109_v4 = vpop.f32.mrf.mxu0  ;;  %v1230_v5 = vpop.f32.mrf.mxu1 }
 0x2ac   : > { %v1110_v6 = vadd.f32 %v1109_v4, %v4488_v23  ;;  %v1231_v7 = vadd.f32 %v1230_v5, %v4488_v23  ;;  %3824 = vmatpush3.bf16.msra.mxu0 %v4120_v54  ;;  %3856 = vmatpush3.bf16.msra.mxu1 %v4120_v54  ;;  %v1160_v8 = vmax.f32 %v1118_v0, 0.0  ;;  %v1281_v9 = vmax.f32 %v1239_v1, 0.0 }
 0x2ad   : > { %3825 = vmatprep.subr.bf16.mxu0 %v4121_v61  ;;  %3857 = vmatprep.subr.bf16.mxu1 %v4121_v61 }
 0x2ae   : > { %v1158_v13 = vmax.f32 %v1110_v6, 0.0  ;;  %v1279_v14 = vmax.f32 %v1231_v7, 0.0  ;;  %v1172_v18 = vpack.c.bf16 %v1160_v8, %v1159_v15  ;;  %v1293_v19 = vpack.c.bf16 %v1281_v9, %v1280_v16  ;;  %v4124_v15 = vld [vmem:[%s4829_s2 + $0xc8] sm:$0xff]   ;;  %v4125_v16 = vld [vmem:[%s4829_s2 + $0xc0] sm:$0xff]  }
 0x2b0   : > { %v1171_v17 = vpack.c.bf16 %v1158_v13, %v1157_v11  ;;  %v1292_v25 = vpack.c.bf16 %v1279_v14, %v1278_v12  ;;  %3826 = vmatpush3.bf16.msra.mxu0 %v4121_v61  ;;  %3858 = vmatpush3.bf16.msra.mxu1 %v4121_v61 }
 0x2b1   : > { %3827 = vmatprep.subr.bf16.mxu0 %v4122_v10  ;;  %3859 = vmatprep.subr.bf16.mxu1 %v4122_v10 }
 0x2b2   : > { %3775 = vmatprep.mubr.bf16.mxu0 %v1171_v17  ;;  %3807 = vmatprep.mubr.bf16.mxu1 %v1292_v25  ;;  %v4126_v17 = vld [vmem:[%s4829_s2 + $0x138] sm:$0xff]   ;;  %v1317_v25 = vsub.s32 3, %v4359_v53 }
 0x2b3   : > { %3776 = vmatmul.mubr.bf16.gmra.mxu0 %v1172_v18  ;;  %3808 = vmatmul.mubr.bf16.gmra.mxu1 %v1293_v19 }
 0x2b4   : > { %3828 = vmatpush3.bf16.msra.mxu0 %v4122_v10  ;;  %3860 = vmatpush3.bf16.msra.mxu1 %v4122_v10 }
 0x2b5   : > { %v3717_v56 = vpop.f32.mrf.mxu0  ;;  %v3749_v20 = vpop.f32.mrf.mxu1 }
 0x2b6   : > { %v1131_v31 = vadd.f32 %v3717_v56, %v4488_v23  ;;  %v1252_v32 = vadd.f32 %v3749_v20, %v4488_v23  ;;  %v4550_v56 = vld [vmem:[%s4830_s3] sm:$0xff] }
 0x2b7   : > { %v1122_v21 = vpop.f32.mrf.mxu0  ;;  %v1243_v22 = vpop.f32.mrf.mxu1  ;;  %v4553_v20 = vrot.slane %v4550_v56, %v1317_v25 }
 0x2b8   : > { %v1123_v27 = vadd.f32 %v1122_v21, %v4488_v23  ;;  %v1244_v28 = vadd.f32 %v1243_v22, %v4488_v23  ;;  %v1163_v42 = vmax.f32 %v1131_v31, 0.0  ;;  %v1284_v43 = vmax.f32 %v1252_v32, 0.0 }
 0x2b9   : > { %v3718_v24 = vpop.f32.mrf.mxu0  ;;  %v3750_v26 = vpop.f32.mrf.mxu1 }
 0x2ba   : > { %v1134_v29 = vadd.f32 %v3718_v24, %v4488_v23  ;;  %v1255_v30 = vadd.f32 %v3750_v26, %v4488_v23  ;;  %v1161_v38 = vmax.f32 %v1123_v27, 0.0  ;;  %v1282_v39 = vmax.f32 %v1244_v28, 0.0 }
 0x2bb   : > { %v1125_v33 = vpop.f32.mrf.mxu0  ;;  %v1246_v34 = vpop.f32.mrf.mxu1 }
 0x2bc   : > { %v1126_v35 = vadd.f32 %v1125_v33, %v4488_v23  ;;  %v1247_v36 = vadd.f32 %v1246_v34, %v4488_v23  ;;  %v1164_v55 = vmax.f32 %v1134_v29, 0.0  ;;  %v1285_v37 = vmax.f32 %v1255_v30, 0.0 }
 0x2be   : > { %v1162_v40 = vmax.f32 %v1126_v35, 0.0  ;;  %v1283_v41 = vmax.f32 %v1247_v36, 0.0  ;;  %v1174_v46 = vpack.c.bf16 %v1164_v55, %v1163_v42  ;;  %v1295_v47 = vpack.c.bf16 %v1285_v37, %v1284_v43 }
 0x2c0   : > { %v1173_v44 = vpack.c.bf16 %v1162_v40, %v1161_v38  ;;  %v1294_v45 = vpack.c.bf16 %v1283_v41, %v1282_v39 }
 0x2c2   : > { %3779 = vmatprep.mubr.bf16.mxu0 %v1173_v44  ;;  %3811 = vmatprep.mubr.bf16.mxu1 %v1294_v45 }
 0x2c3   : > { %3780 = vmatmul.mubr.bf16.gmra.mxu0 %v1174_v46  ;;  %3812 = vmatmul.mubr.bf16.gmra.mxu1 %v1295_v47 }
 0x2c5   : > { %v3721_v48 = vpop.f32.mrf.mxu0  ;;  %v3753_v49 = vpop.f32.mrf.mxu1 }
 0x2c6   : > { %v1147_v61 = vadd.f32 %v3721_v48, %v4488_v23  ;;  %v1268_v62 = vadd.f32 %v3753_v49, %v4488_v23  ;;  %v4127_v48 = vld [vmem:[%s4829_s2 + $0x130] sm:$0xff]  }
 0x2c7   : > { %v1138_v50 = vpop.f32.mrf.mxu0  ;;  %v1259_v51 = vpop.f32.mrf.mxu1 }
 0x2c8   : > { %v1139_v57 = vadd.f32 %v1138_v50, %v4488_v23  ;;  %v1260_v58 = vadd.f32 %v1259_v51, %v4488_v23  ;;  %v1167_v9 = vmax.f32 %v1147_v61, 0.0  ;;  %v1288_v10 = vmax.f32 %v1268_v62, 0.0  ;;  %v4128_v51 = vld [vmem:[%s4829_s2 + $0x128] sm:$0xff]  }
 0x2c9   : > { %v3722_v52 = vpop.f32.mrf.mxu0  ;;  %v3754_v54 = vpop.f32.mrf.mxu1 }
 0x2ca   : > { %v1150_v59 = vadd.f32 %v3722_v52, %v4488_v23  ;;  %v1271_v60 = vadd.f32 %v3754_v54, %v4488_v23  ;;  %v1165_v5 = vmax.f32 %v1139_v57, 0.0  ;;  %v1286_v6 = vmax.f32 %v1260_v58, 0.0 }
 0x2cb   : > { %v1141_v63 = vpop.f32.mrf.mxu0  ;;  %v1262_v0 = vpop.f32.mrf.mxu1 }
 0x2cc   : > { %v1142_v1 = vadd.f32 %v1141_v63, %v4488_v23  ;;  %v1263_v2 = vadd.f32 %v1262_v0, %v4488_v23  ;;  %v1168_v3 = vmax.f32 %v1150_v59, 0.0  ;;  %v1289_v4 = vmax.f32 %v1271_v60, 0.0  ;;  %v4123_v23 = vld [vmem:[%s4829_s2 + $0xd0] sm:$0xff]   ;;  %v4129_v59 = vld [vmem:[%s4829_s2 + $0x120] sm:$0xff]  }
 0x2cd   : > { %3829 = vmatprep.subr.bf16.mxu0 %v4123_v23  ;;  %3861 = vmatprep.subr.bf16.mxu1 %v4123_v23 }
 0x2ce   : > { %v1166_v7 = vmax.f32 %v1142_v1, 0.0  ;;  %v1287_v8 = vmax.f32 %v1263_v2, 0.0  ;;  %v1176_v13 = vpack.c.bf16 %v1168_v3, %v1167_v9  ;;  %v1297_v14 = vpack.c.bf16 %v1289_v4, %v1288_v10  ;;  %3830 = vmatpush3.bf16.msra.mxu0 %v4123_v23  ;;  %3862 = vmatpush3.bf16.msra.mxu1 %v4123_v23 }
 0x2cf   : > { %3831 = vmatprep.subr.bf16.mxu0 %v4124_v15  ;;  %3863 = vmatprep.subr.bf16.mxu1 %v4124_v15 }
 0x2d0   : > { %v1175_v11 = vpack.c.bf16 %v1166_v7, %v1165_v5  ;;  %v1296_v12 = vpack.c.bf16 %v1287_v8, %v1286_v6  ;;  %v4130_v8 = vld [vmem:[%s4829_s2 + $0x118] sm:$0xff]  }
 0x2d2   : > { %3783 = vmatprep.mubr.bf16.mxu0 %v1175_v11  ;;  %3815 = vmatprep.mubr.bf16.mxu1 %v1296_v12 }
 0x2d3   : > { %3784 = vmatmul.mubr.bf16.gmra.mxu0 %v1176_v13  ;;  %3816 = vmatmul.mubr.bf16.gmra.mxu1 %v1297_v14 }
 0x2d4   : > { %3832 = vmatpush3.bf16.msra.mxu0 %v4124_v15  ;;  %3864 = vmatpush3.bf16.msra.mxu1 %v4124_v15 }
 0x2d5   : > { %3833 = vmatprep.subr.bf16.mxu0 %v4125_v16  ;;  %3865 = vmatprep.subr.bf16.mxu1 %v4125_v16 }
 0x2d8   : > { %3834 = vmatpush3.bf16.msra.mxu0 %v4125_v16  ;;  %3866 = vmatpush3.bf16.msra.mxu1 %v4125_v16 }
 0x2d9   : > { %3883 = vmatprep.subr.bf16.mxu0 %v4126_v17  ;;  %3915 = vmatprep.subr.bf16.mxu1 %v4126_v17 }
 0x363   : > { %v3773_v18 = vpop.f32.mrf.mxu0  ;;  %v3805_v19 = vpop.f32.mrf.mxu1 }
 0x364   : > { %v1410_v31 = vadd.f32 %v3773_v18, %v4553_v20  ;;  %v1531_v32 = vadd.f32 %v3805_v19, %v4553_v20 }
 0x365   : > { %v1401_v21 = vpop.f32.mrf.mxu0  ;;  %v1522_v22 = vpop.f32.mrf.mxu1 }
 0x366   : > { %v1402_v27 = vadd.f32 %v1401_v21, %v4553_v20  ;;  %v1523_v28 = vadd.f32 %v1522_v22, %v4553_v20  ;;  %v1466_v42 = vmax.f32 %v1410_v31, 0.0  ;;  %v1587_v43 = vmax.f32 %v1531_v32, 0.0 }
 0x367   : > { %v3774_v24 = vpop.f32.mrf.mxu0  ;;  %v3806_v26 = vpop.f32.mrf.mxu1 }
 0x368   : > { %v1413_v29 = vadd.f32 %v3774_v24, %v4553_v20  ;;  %v1534_v30 = vadd.f32 %v3806_v26, %v4553_v20  ;;  %v1464_v38 = vmax.f32 %v1402_v27, 0.0  ;;  %v1585_v39 = vmax.f32 %v1523_v28, 0.0 }
 0x369   : > { %v1404_v33 = vpop.f32.mrf.mxu0  ;;  %v1525_v34 = vpop.f32.mrf.mxu1 }
 0x36a   : > { %v1405_v35 = vadd.f32 %v1404_v33, %v4553_v20  ;;  %v1526_v36 = vadd.f32 %v1525_v34, %v4553_v20  ;;  %v1467_v55 = vmax.f32 %v1413_v29, 0.0  ;;  %v1588_v37 = vmax.f32 %v1534_v30, 0.0 }
 0x36c   : > { %v1465_v40 = vmax.f32 %v1405_v35, 0.0  ;;  %v1586_v41 = vmax.f32 %v1526_v36, 0.0  ;;  %v1481_v46 = vpack.c.bf16 %v1467_v55, %v1466_v42  ;;  %v1602_v47 = vpack.c.bf16 %v1588_v37, %v1587_v43 }
 0x36e   : > { %v1480_v44 = vpack.c.bf16 %v1465_v40, %v1464_v38  ;;  %v1601_v45 = vpack.c.bf16 %v1586_v41, %v1585_v39 }
 0x370   : > { %3835 = vmatprep.mubr.bf16.mxu0 %v1480_v44  ;;  %3867 = vmatprep.mubr.bf16.mxu1 %v1601_v45 }
 0x371   : > { %3836 = vmatmul.mubr.bf16.vlgmr.msra.gmra.mxu0 %v1481_v46  ;;  %3868 = vmatmul.mubr.bf16.vlgmr.msra.gmra.mxu1 %v1602_v47 }
 0x372   : > { %3884 = vmatpush3.bf16.msra.mxu0 %v4126_v17  ;;  %3916 = vmatpush3.bf16.msra.mxu1 %v4126_v17 }
 0x373   : > { %v3777_v49 = vpop.f32.mrf.mxu0  ;;  %v3809_v50 = vpop.f32.mrf.mxu1  ;;  %3885 = vmatprep.subr.bf16.mxu0 %v4127_v48  ;;  %3917 = vmatprep.subr.bf16.mxu1 %v4127_v48 }
 0x374   : > { %v1426_v0 = vadd.f32 %v3777_v49, %v4553_v20  ;;  %v1547_v1 = vadd.f32 %v3809_v50, %v4553_v20 }
 0x375   : > { %v1417_v52 = vpop.f32.mrf.mxu0  ;;  %v1538_v54 = vpop.f32.mrf.mxu1 }
 0x376   : > { %3886 = vmatpush3.bf16.msra.mxu0 %v4127_v48  ;;  %3918 = vmatpush3.bf16.msra.mxu1 %v4127_v48  ;;  %v1418_v60 = vadd.f32 %v1417_v52, %v4553_v20  ;;  %v1539_v61 = vadd.f32 %v1538_v54, %v4553_v20  ;;  %v1470_v13 = vmax.f32 %v1426_v0, 0.0  ;;  %v1591_v14 = vmax.f32 %v1547_v1, 0.0 }
 0x377   : > { %v3778_v57 = vpop.f32.mrf.mxu0  ;;  %v3810_v58 = vpop.f32.mrf.mxu1  ;;  %3887 = vmatprep.subr.bf16.mxu0 %v4128_v51  ;;  %3919 = vmatprep.subr.bf16.mxu1 %v4128_v51 }
 0x378   : > { %v1429_v62 = vadd.f32 %v3778_v57, %v4553_v20  ;;  %v1550_v63 = vadd.f32 %v3810_v58, %v4553_v20  ;;  %v1468_v9 = vmax.f32 %v1418_v60, 0.0  ;;  %v1589_v10 = vmax.f32 %v1539_v61, 0.0 }
 0x379   : > { %v1420_v2 = vpop.f32.mrf.mxu0  ;;  %v1541_v3 = vpop.f32.mrf.mxu1 }
 0x37a   : > { %v1421_v4 = vadd.f32 %v1420_v2, %v4553_v20  ;;  %v1542_v5 = vadd.f32 %v1541_v3, %v4553_v20  ;;  %3888 = vmatpush3.bf16.msra.mxu0 %v4128_v51  ;;  %3920 = vmatpush3.bf16.msra.mxu1 %v4128_v51  ;;  %v1471_v6 = vmax.f32 %v1429_v62, 0.0  ;;  %v1592_v7 = vmax.f32 %v1550_v63, 0.0 }
 0x37b   : > { %3889 = vmatprep.subr.bf16.mxu0 %v4129_v59  ;;  %3921 = vmatprep.subr.bf16.mxu1 %v4129_v59 }
 0x37c   : > { %v1469_v11 = vmax.f32 %v1421_v4, 0.0  ;;  %v1590_v12 = vmax.f32 %v1542_v5, 0.0  ;;  %v1483_v16 = vpack.c.bf16 %v1471_v6, %v1470_v13  ;;  %v1604_v17 = vpack.c.bf16 %v1592_v7, %v1591_v14  ;;  %v4132_v14 = vld [vmem:[%s4829_s2 + $0x108] sm:$0xff]  }
 0x37e   : > { %v1482_v23 = vpack.c.bf16 %v1469_v11, %v1468_v9  ;;  %v1603_v15 = vpack.c.bf16 %v1590_v12, %v1589_v10  ;;  %3890 = vmatpush3.bf16.msra.mxu0 %v4129_v59  ;;  %3922 = vmatpush3.bf16.msra.mxu1 %v4129_v59 }
 0x37f   : > { %3891 = vmatprep.subr.bf16.mxu0 %v4130_v8  ;;  %3923 = vmatprep.subr.bf16.mxu1 %v4130_v8 }
 0x380   : > { %3839 = vmatprep.mubr.bf16.mxu0 %v1482_v23  ;;  %3871 = vmatprep.mubr.bf16.mxu1 %v1603_v15  ;;  %v4133_v23 = vld [vmem:[%s4829_s2 + $0x100] sm:$0xff]   ;;  %v4134_v15 = vld [vmem:[%s4829_s2 + $0x178] sm:$0xff]  }
 0x381   : > { %3840 = vmatmul.mubr.bf16.gmra.mxu0 %v1483_v16  ;;  %3872 = vmatmul.mubr.bf16.gmra.mxu1 %v1604_v17  ;;  %v1628_v16 = vsub.s32 4, %v4359_v53 }
 0x382   : > { %3892 = vmatpush3.bf16.msra.mxu0 %v4130_v8  ;;  %3924 = vmatpush3.bf16.msra.mxu1 %v4130_v8 }
 0x383   : > { %v3781_v25 = vpop.f32.mrf.mxu0  ;;  %v3813_v18 = vpop.f32.mrf.mxu1 }
 0x384   : > { %v1442_v30 = vadd.f32 %v3781_v25, %v4553_v20  ;;  %v1563_v31 = vadd.f32 %v3813_v18, %v4553_v20  ;;  %v4613_v18 = vrot.slane %v4550_v56, %v1628_v16 }
 0x385   : > { %v1433_v19 = vpop.f32.mrf.mxu0  ;;  %v1554_v21 = vpop.f32.mrf.mxu1 }
 0x386   : > { %v1434_v26 = vadd.f32 %v1433_v19, %v4553_v20  ;;  %v1555_v27 = vadd.f32 %v1554_v21, %v4553_v20  ;;  %v1474_v41 = vmax.f32 %v1442_v30, 0.0  ;;  %v1595_v42 = vmax.f32 %v1563_v31, 0.0 }
 0x387   : > { %v3782_v22 = vpop.f32.mrf.mxu0  ;;  %v3814_v24 = vpop.f32.mrf.mxu1 }
 0x388   : > { %v1445_v28 = vadd.f32 %v3782_v22, %v4553_v20  ;;  %v1566_v29 = vadd.f32 %v3814_v24, %v4553_v20  ;;  %v1472_v37 = vmax.f32 %v1434_v26, 0.0  ;;  %v1593_v38 = vmax.f32 %v1555_v27, 0.0 }
 0x389   : > { %v1436_v32 = vpop.f32.mrf.mxu0  ;;  %v1557_v33 = vpop.f32.mrf.mxu1 }
 0x38a   : > { %v1437_v34 = vadd.f32 %v1436_v32, %v4553_v20  ;;  %v1558_v35 = vadd.f32 %v1557_v33, %v4553_v20  ;;  %v1475_v36 = vmax.f32 %v1445_v28, 0.0  ;;  %v1596_v55 = vmax.f32 %v1566_v29, 0.0 }
 0x38c   : > { %v1473_v39 = vmax.f32 %v1437_v34, 0.0  ;;  %v1594_v40 = vmax.f32 %v1558_v35, 0.0  ;;  %v1485_v45 = vpack.c.bf16 %v1475_v36, %v1474_v41  ;;  %v1606_v46 = vpack.c.bf16 %v1596_v55, %v1595_v42 }
 0x38e   : > { %v1484_v43 = vpack.c.bf16 %v1473_v39, %v1472_v37  ;;  %v1605_v44 = vpack.c.bf16 %v1594_v40, %v1593_v38 }
 0x390   : > { %3843 = vmatprep.mubr.bf16.mxu0 %v1484_v43  ;;  %3875 = vmatprep.mubr.bf16.mxu1 %v1605_v44 }
 0x391   : > { %3844 = vmatmul.mubr.bf16.gmra.mxu0 %v1485_v45  ;;  %3876 = vmatmul.mubr.bf16.gmra.mxu1 %v1606_v46 }
 0x393   : > { %v3785_v47 = vpop.f32.mrf.mxu0  ;;  %v3817_v48 = vpop.f32.mrf.mxu1 }
 0x394   : > { %v1458_v60 = vadd.f32 %v3785_v47, %v4553_v20  ;;  %v1579_v61 = vadd.f32 %v3817_v48, %v4553_v20  ;;  %v4135_v47 = vld [vmem:[%s4829_s2 + $0x170] sm:$0xff]  }
 0x395   : > { %v1449_v49 = vpop.f32.mrf.mxu0  ;;  %v1570_v50 = vpop.f32.mrf.mxu1 }
 0x396   : > { %v1450_v54 = vadd.f32 %v1449_v49, %v4553_v20  ;;  %v1571_v57 = vadd.f32 %v1570_v50, %v4553_v20  ;;  %v1478_v8 = vmax.f32 %v1458_v60, 0.0  ;;  %v1599_v9 = vmax.f32 %v1579_v61, 0.0  ;;  %v4136_v50 = vld [vmem:[%s4829_s2 + $0x168] sm:$0xff]  }
 0x397   : > { %v3786_v51 = vpop.f32.mrf.mxu0  ;;  %v3818_v52 = vpop.f32.mrf.mxu1 }
 0x398   : > { %v1461_v58 = vadd.f32 %v3786_v51, %v4553_v20  ;;  %v1582_v59 = vadd.f32 %v3818_v52, %v4553_v20  ;;  %v1476_v4 = vmax.f32 %v1450_v54, 0.0  ;;  %v1597_v5 = vmax.f32 %v1571_v57, 0.0 }
 0x399   : > { %v1452_v62 = vpop.f32.mrf.mxu0  ;;  %v1573_v63 = vpop.f32.mrf.mxu1 }
 0x39a   : > { %v1453_v0 = vadd.f32 %v1452_v62, %v4553_v20  ;;  %v1574_v1 = vadd.f32 %v1573_v63, %v4553_v20  ;;  %v1479_v2 = vmax.f32 %v1461_v58, 0.0  ;;  %v1600_v3 = vmax.f32 %v1582_v59, 0.0  ;;  %v4131_v20 = vld [vmem:[%s4829_s2 + $0x110] sm:$0xff]   ;;  %v4137_v58 = vld [vmem:[%s4829_s2 + $0x160] sm:$0xff]  }
 0x39b   : > { %3893 = vmatprep.subr.bf16.mxu0 %v4131_v20  ;;  %3925 = vmatprep.subr.bf16.mxu1 %v4131_v20 }
 0x39c   : > { %v1477_v6 = vmax.f32 %v1453_v0, 0.0  ;;  %v1598_v7 = vmax.f32 %v1574_v1, 0.0  ;;  %v1487_v12 = vpack.c.bf16 %v1479_v2, %v1478_v8  ;;  %v1608_v13 = vpack.c.bf16 %v1600_v3, %v1599_v9  ;;  %3894 = vmatpush3.bf16.msra.mxu0 %v4131_v20  ;;  %3926 = vmatpush3.bf16.msra.mxu1 %v4131_v20 }
 0x39d   : > { %3895 = vmatprep.subr.bf16.mxu0 %v4132_v14  ;;  %3927 = vmatprep.subr.bf16.mxu1 %v4132_v14 }
 0x39e   : > { %v1486_v10 = vpack.c.bf16 %v1477_v6, %v1476_v4  ;;  %v1607_v11 = vpack.c.bf16 %v1598_v7, %v1597_v5  ;;  %v4138_v7 = vld [vmem:[%s4829_s2 + $0x158] sm:$0xff]  }
 0x3a0   : > { %3847 = vmatprep.mubr.bf16.mxu0 %v1486_v10  ;;  %3879 = vmatprep.mubr.bf16.mxu1 %v1607_v11 }
 0x3a1   : > { %3848 = vmatmul.mubr.bf16.gmra.mxu0 %v1487_v12  ;;  %3880 = vmatmul.mubr.bf16.gmra.mxu1 %v1608_v13 }
 0x3a2   : > { %3896 = vmatpush3.bf16.msra.mxu0 %v4132_v14  ;;  %3928 = vmatpush3.bf16.msra.mxu1 %v4132_v14 }
 0x3a3   : > { %3897 = vmatprep.subr.bf16.mxu0 %v4133_v23  ;;  %3929 = vmatprep.subr.bf16.mxu1 %v4133_v23 }
 0x3a6   : > { %3898 = vmatpush3.bf16.msra.mxu0 %v4133_v23  ;;  %3930 = vmatpush3.bf16.msra.mxu1 %v4133_v23 }
 0x3a7   : > { %3947 = vmatprep.subr.bf16.mxu0 %v4134_v15  ;;  %3979 = vmatprep.subr.bf16.mxu1 %v4134_v15 }
 0x431   : > { %v3837_v17 = vpop.f32.mrf.mxu0  ;;  %v3869_v25 = vpop.f32.mrf.mxu1 }
 0x432   : > { %v1721_v30 = vadd.f32 %v3837_v17, %v4613_v18  ;;  %v1842_v31 = vadd.f32 %v3869_v25, %v4613_v18 }
 0x433   : > { %v1712_v19 = vpop.f32.mrf.mxu0  ;;  %v1833_v21 = vpop.f32.mrf.mxu1 }
 0x434   : > { %v1713_v26 = vadd.f32 %v1712_v19, %v4613_v18  ;;  %v1834_v27 = vadd.f32 %v1833_v21, %v4613_v18  ;;  %v1777_v41 = vmax.f32 %v1721_v30, 0.0  ;;  %v1898_v42 = vmax.f32 %v1842_v31, 0.0 }
 0x435   : > { %v3838_v22 = vpop.f32.mrf.mxu0  ;;  %v3870_v24 = vpop.f32.mrf.mxu1 }
 0x436   : > { %v1724_v28 = vadd.f32 %v3838_v22, %v4613_v18  ;;  %v1845_v29 = vadd.f32 %v3870_v24, %v4613_v18  ;;  %v1775_v37 = vmax.f32 %v1713_v26, 0.0  ;;  %v1896_v38 = vmax.f32 %v1834_v27, 0.0 }
 0x437   : > { %v1715_v32 = vpop.f32.mrf.mxu0  ;;  %v1836_v33 = vpop.f32.mrf.mxu1 }
 0x438   : > { %v1716_v34 = vadd.f32 %v1715_v32, %v4613_v18  ;;  %v1837_v35 = vadd.f32 %v1836_v33, %v4613_v18  ;;  %v1778_v36 = vmax.f32 %v1724_v28, 0.0  ;;  %v1899_v55 = vmax.f32 %v1845_v29, 0.0 }
 0x43a   : > { %v1776_v39 = vmax.f32 %v1716_v34, 0.0  ;;  %v1897_v40 = vmax.f32 %v1837_v35, 0.0  ;;  %v1792_v45 = vpack.c.bf16 %v1778_v36, %v1777_v41  ;;  %v1913_v46 = vpack.c.bf16 %v1899_v55, %v1898_v42 }
 0x43c   : > { %v1791_v43 = vpack.c.bf16 %v1776_v39, %v1775_v37  ;;  %v1912_v44 = vpack.c.bf16 %v1897_v40, %v1896_v38 }
 0x43e   : > { %3899 = vmatprep.mubr.bf16.mxu0 %v1791_v43  ;;  %3931 = vmatprep.mubr.bf16.mxu1 %v1912_v44 }
 0x43f   : > { %3900 = vmatmul.mubr.bf16.vlgmr.msra.gmra.mxu0 %v1792_v45  ;;  %3932 = vmatmul.mubr.bf16.vlgmr.msra.gmra.mxu1 %v1913_v46 }
 0x440   : > { %3948 = vmatpush3.bf16.msra.mxu0 %v4134_v15  ;;  %3980 = vmatpush3.bf16.msra.mxu1 %v4134_v15 }
 0x441   : > { %v3841_v48 = vpop.f32.mrf.mxu0  ;;  %v3873_v49 = vpop.f32.mrf.mxu1  ;;  %3949 = vmatprep.subr.bf16.mxu0 %v4135_v47  ;;  %3981 = vmatprep.subr.bf16.mxu1 %v4135_v47 }
 0x442   : > { %v1737_v63 = vadd.f32 %v3841_v48, %v4613_v18  ;;  %v1858_v0 = vadd.f32 %v3873_v49, %v4613_v18 }
 0x443   : > { %v1728_v51 = vpop.f32.mrf.mxu0  ;;  %v1849_v52 = vpop.f32.mrf.mxu1 }
 0x444   : > { %3950 = vmatpush3.bf16.msra.mxu0 %v4135_v47  ;;  %3982 = vmatpush3.bf16.msra.mxu1 %v4135_v47  ;;  %v1729_v59 = vadd.f32 %v1728_v51, %v4613_v18  ;;  %v1850_v60 = vadd.f32 %v1849_v52, %v4613_v18  ;;  %v1781_v12 = vmax.f32 %v1737_v63, 0.0  ;;  %v1902_v13 = vmax.f32 %v1858_v0, 0.0 }
 0x445   : > { %v3842_v54 = vpop.f32.mrf.mxu0  ;;  %v3874_v57 = vpop.f32.mrf.mxu1  ;;  %3951 = vmatprep.subr.bf16.mxu0 %v4136_v50  ;;  %3983 = vmatprep.subr.bf16.mxu1 %v4136_v50 }
 0x446   : > { %v1740_v61 = vadd.f32 %v3842_v54, %v4613_v18  ;;  %v1861_v62 = vadd.f32 %v3874_v57, %v4613_v18  ;;  %v1779_v8 = vmax.f32 %v1729_v59, 0.0  ;;  %v1900_v9 = vmax.f32 %v1850_v60, 0.0 }
 0x447   : > { %v1731_v1 = vpop.f32.mrf.mxu0  ;;  %v1852_v2 = vpop.f32.mrf.mxu1 }
 0x448   : > { %v1732_v3 = vadd.f32 %v1731_v1, %v4613_v18  ;;  %v1853_v4 = vadd.f32 %v1852_v2, %v4613_v18  ;;  %3952 = vmatpush3.bf16.msra.mxu0 %v4136_v50  ;;  %3984 = vmatpush3.bf16.msra.mxu1 %v4136_v50  ;;  %v1782_v5 = vmax.f32 %v1740_v61, 0.0  ;;  %v1903_v6 = vmax.f32 %v1861_v62, 0.0 }
 0x449   : > { %3953 = vmatprep.subr.bf16.mxu0 %v4137_v58  ;;  %3985 = vmatprep.subr.bf16.mxu1 %v4137_v58 }
 0x44a   : > { %v1780_v10 = vmax.f32 %v1732_v3, 0.0  ;;  %v1901_v11 = vmax.f32 %v1853_v4, 0.0  ;;  %v1794_v23 = vpack.c.bf16 %v1782_v5, %v1781_v12  ;;  %v1915_v15 = vpack.c.bf16 %v1903_v6, %v1902_v13  ;;  %v4140_v13 = vld [vmem:[%s4829_s2 + $0x148] sm:$0xff]  }
 0x44c   : > { %v1793_v20 = vpack.c.bf16 %v1780_v10, %v1779_v8  ;;  %v1914_v14 = vpack.c.bf16 %v1901_v11, %v1900_v9  ;;  %3954 = vmatpush3.bf16.msra.mxu0 %v4137_v58  ;;  %3986 = vmatpush3.bf16.msra.mxu1 %v4137_v58 }
 0x44d   : > { %3955 = vmatprep.subr.bf16.mxu0 %v4138_v7  ;;  %3987 = vmatprep.subr.bf16.mxu1 %v4138_v7 }
 0x44e   : > { %3903 = vmatprep.mubr.bf16.mxu0 %v1793_v20  ;;  %3935 = vmatprep.mubr.bf16.mxu1 %v1914_v14  ;;  %v4141_v20 = vld [vmem:[%s4829_s2 + $0x140] sm:$0xff]   ;;  %v4142_v14 = vld [vmem:[%s4829_s2 + $0x1b8] sm:$0xff]  }
 0x44f   : > { %3904 = vmatmul.mubr.bf16.gmra.mxu0 %v1794_v23  ;;  %3936 = vmatmul.mubr.bf16.gmra.mxu1 %v1915_v15  ;;  %v1939_v23 = vsub.s32 5, %v4359_v53 }
 0x450   : > { %3956 = vmatpush3.bf16.msra.mxu0 %v4138_v7  ;;  %3988 = vmatpush3.bf16.msra.mxu1 %v4138_v7 }
 0x451   : > { %v3845_v16 = vpop.f32.mrf.mxu0  ;;  %v3877_v17 = vpop.f32.mrf.mxu1 }
 0x452   : > { %v1753_v29 = vadd.f32 %v3845_v16, %v4613_v18  ;;  %v1874_v30 = vadd.f32 %v3877_v17, %v4613_v18  ;;  %v4673_v17 = vrot.slane %v4550_v56, %v1939_v23 }
 0x453   : > { %v1744_v25 = vpop.f32.mrf.mxu0  ;;  %v1865_v19 = vpop.f32.mrf.mxu1 }
 0x454   : > { %v1745_v24 = vadd.f32 %v1744_v25, %v4613_v18  ;;  %v1866_v26 = vadd.f32 %v1865_v19, %v4613_v18  ;;  %v1785_v40 = vmax.f32 %v1753_v29, 0.0  ;;  %v1906_v41 = vmax.f32 %v1874_v30, 0.0 }
 0x455   : > { %v3846_v21 = vpop.f32.mrf.mxu0  ;;  %v3878_v22 = vpop.f32.mrf.mxu1 }
 0x456   : > { %v1756_v27 = vadd.f32 %v3846_v21, %v4613_v18  ;;  %v1877_v28 = vadd.f32 %v3878_v22, %v4613_v18  ;;  %v1783_v55 = vmax.f32 %v1745_v24, 0.0  ;;  %v1904_v37 = vmax.f32 %v1866_v26, 0.0 }
 0x457   : > { %v1747_v31 = vpop.f32.mrf.mxu0  ;;  %v1868_v32 = vpop.f32.mrf.mxu1 }
 0x458   : > { %v1748_v33 = vadd.f32 %v1747_v31, %v4613_v18  ;;  %v1869_v34 = vadd.f32 %v1868_v32, %v4613_v18  ;;  %v1786_v35 = vmax.f32 %v1756_v27, 0.0  ;;  %v1907_v36 = vmax.f32 %v1877_v28, 0.0 }
 0x45a   : > { %v1784_v38 = vmax.f32 %v1748_v33, 0.0  ;;  %v1905_v39 = vmax.f32 %v1869_v34, 0.0  ;;  %v1796_v44 = vpack.c.bf16 %v1786_v35, %v1785_v40  ;;  %v1917_v45 = vpack.c.bf16 %v1907_v36, %v1906_v41 }
 0x45c   : > { %v1795_v42 = vpack.c.bf16 %v1784_v38, %v1783_v55  ;;  %v1916_v43 = vpack.c.bf16 %v1905_v39, %v1904_v37 }
 0x45e   : > { %3907 = vmatprep.mubr.bf16.mxu0 %v1795_v42  ;;  %3939 = vmatprep.mubr.bf16.mxu1 %v1916_v43 }
 0x45f   : > { %3908 = vmatmul.mubr.bf16.gmra.mxu0 %v1796_v44  ;;  %3940 = vmatmul.mubr.bf16.gmra.mxu1 %v1917_v45 }
 0x461   : > { %v3849_v46 = vpop.f32.mrf.mxu0  ;;  %v3881_v47 = vpop.f32.mrf.mxu1 }
 0x462   : > { %v1769_v59 = vadd.f32 %v3849_v46, %v4613_v18  ;;  %v1890_v60 = vadd.f32 %v3881_v47, %v4613_v18  ;;  %v4143_v46 = vld [vmem:[%s4829_s2 + $0x1b0] sm:$0xff]  }
 0x463   : > { %v1760_v48 = vpop.f32.mrf.mxu0  ;;  %v1881_v49 = vpop.f32.mrf.mxu1 }
 0x464   : > { %v1761_v52 = vadd.f32 %v1760_v48, %v4613_v18  ;;  %v1882_v54 = vadd.f32 %v1881_v49, %v4613_v18  ;;  %v1789_v7 = vmax.f32 %v1769_v59, 0.0  ;;  %v1910_v8 = vmax.f32 %v1890_v60, 0.0  ;;  %v4144_v49 = vld [vmem:[%s4829_s2 + $0x1a8] sm:$0xff]  }
 0x465   : > { %v3850_v50 = vpop.f32.mrf.mxu0  ;;  %v3882_v51 = vpop.f32.mrf.mxu1 }
 0x466   : > { %v1772_v57 = vadd.f32 %v3850_v50, %v4613_v18  ;;  %v1893_v58 = vadd.f32 %v3882_v51, %v4613_v18  ;;  %v1787_v3 = vmax.f32 %v1761_v52, 0.0  ;;  %v1908_v4 = vmax.f32 %v1882_v54, 0.0 }
 0x467   : > { %v1763_v61 = vpop.f32.mrf.mxu0  ;;  %v1884_v62 = vpop.f32.mrf.mxu1 }
 0x468   : > { %v1764_v63 = vadd.f32 %v1763_v61, %v4613_v18  ;;  %v1885_v0 = vadd.f32 %v1884_v62, %v4613_v18  ;;  %v1790_v1 = vmax.f32 %v1772_v57, 0.0  ;;  %v1911_v2 = vmax.f32 %v1893_v58, 0.0  ;;  %v4139_v18 = vld [vmem:[%s4829_s2 + $0x150] sm:$0xff]   ;;  %v4145_v57 = vld [vmem:[%s4829_s2 + $0x1a0] sm:$0xff]  }
 0x469   : > { %3957 = vmatprep.subr.bf16.mxu0 %v4139_v18  ;;  %3989 = vmatprep.subr.bf16.mxu1 %v4139_v18 }
 0x46a   : > { %v1788_v5 = vmax.f32 %v1764_v63, 0.0  ;;  %v1909_v6 = vmax.f32 %v1885_v0, 0.0  ;;  %v1798_v11 = vpack.c.bf16 %v1790_v1, %v1789_v7  ;;  %v1919_v12 = vpack.c.bf16 %v1911_v2, %v1910_v8  ;;  %3958 = vmatpush3.bf16.msra.mxu0 %v4139_v18  ;;  %3990 = vmatpush3.bf16.msra.mxu1 %v4139_v18 }
 0x46b   : > { %3959 = vmatprep.subr.bf16.mxu0 %v4140_v13  ;;  %3991 = vmatprep.subr.bf16.mxu1 %v4140_v13 }
 0x46c   : > { %v1797_v9 = vpack.c.bf16 %v1788_v5, %v1787_v3  ;;  %v1918_v10 = vpack.c.bf16 %v1909_v6, %v1908_v4  ;;  %v4146_v6 = vld [vmem:[%s4829_s2 + $0x198] sm:$0xff]  }
 0x46e   : > { %3911 = vmatprep.mubr.bf16.mxu0 %v1797_v9  ;;  %3943 = vmatprep.mubr.bf16.mxu1 %v1918_v10 }
 0x46f   : > { %3912 = vmatmul.mubr.bf16.gmra.mxu0 %v1798_v11  ;;  %3944 = vmatmul.mubr.bf16.gmra.mxu1 %v1919_v12 }
 0x470   : > { %3960 = vmatpush3.bf16.msra.mxu0 %v4140_v13  ;;  %3992 = vmatpush3.bf16.msra.mxu1 %v4140_v13 }
 0x471   : > { %3961 = vmatprep.subr.bf16.mxu0 %v4141_v20  ;;  %3993 = vmatprep.subr.bf16.mxu1 %v4141_v20 }
 0x474   : > { %3962 = vmatpush3.bf16.msra.mxu0 %v4141_v20  ;;  %3994 = vmatpush3.bf16.msra.mxu1 %v4141_v20 }
 0x475   : > { %4011 = vmatprep.subr.bf16.mxu0 %v4142_v14  ;;  %4043 = vmatprep.subr.bf16.mxu1 %v4142_v14 }
 0x4ff   : > { %v3901_v15 = vpop.f32.mrf.mxu0  ;;  %v3933_v16 = vpop.f32.mrf.mxu1 }
 0x500   : > { %v2032_v29 = vadd.f32 %v3901_v15, %v4673_v17  ;;  %v2153_v30 = vadd.f32 %v3933_v16, %v4673_v17 }
 0x501   : > { %v2023_v25 = vpop.f32.mrf.mxu0  ;;  %v2144_v19 = vpop.f32.mrf.mxu1 }
 0x502   : > { %v2024_v24 = vadd.f32 %v2023_v25, %v4673_v17  ;;  %v2145_v26 = vadd.f32 %v2144_v19, %v4673_v17  ;;  %v2088_v40 = vmax.f32 %v2032_v29, 0.0  ;;  %v2209_v41 = vmax.f32 %v2153_v30, 0.0 }
 0x503   : > { %v3902_v21 = vpop.f32.mrf.mxu0  ;;  %v3934_v22 = vpop.f32.mrf.mxu1 }
 0x504   : > { %v2035_v27 = vadd.f32 %v3902_v21, %v4673_v17  ;;  %v2156_v28 = vadd.f32 %v3934_v22, %v4673_v17  ;;  %v2086_v55 = vmax.f32 %v2024_v24, 0.0  ;;  %v2207_v37 = vmax.f32 %v2145_v26, 0.0 }
 0x505   : > { %v2026_v31 = vpop.f32.mrf.mxu0  ;;  %v2147_v32 = vpop.f32.mrf.mxu1 }
 0x506   : > { %v2027_v33 = vadd.f32 %v2026_v31, %v4673_v17  ;;  %v2148_v34 = vadd.f32 %v2147_v32, %v4673_v17  ;;  %v2089_v35 = vmax.f32 %v2035_v27, 0.0  ;;  %v2210_v36 = vmax.f32 %v2156_v28, 0.0 }
 0x508   : > { %v2087_v38 = vmax.f32 %v2027_v33, 0.0  ;;  %v2208_v39 = vmax.f32 %v2148_v34, 0.0  ;;  %v2103_v44 = vpack.c.bf16 %v2089_v35, %v2088_v40  ;;  %v2224_v45 = vpack.c.bf16 %v2210_v36, %v2209_v41 }
 0x50a   : > { %v2102_v42 = vpack.c.bf16 %v2087_v38, %v2086_v55  ;;  %v2223_v43 = vpack.c.bf16 %v2208_v39, %v2207_v37 }
 0x50c   : > { %3963 = vmatprep.mubr.bf16.mxu0 %v2102_v42  ;;  %3995 = vmatprep.mubr.bf16.mxu1 %v2223_v43 }
 0x50d   : > { %3964 = vmatmul.mubr.bf16.vlgmr.msra.gmra.mxu0 %v2103_v44  ;;  %3996 = vmatmul.mubr.bf16.vlgmr.msra.gmra.mxu1 %v2224_v45 }
 0x50e   : > { %4012 = vmatpush3.bf16.msra.mxu0 %v4142_v14  ;;  %4044 = vmatpush3.bf16.msra.mxu1 %v4142_v14 }
 0x50f   : > { %v3905_v47 = vpop.f32.mrf.mxu0  ;;  %v3937_v48 = vpop.f32.mrf.mxu1  ;;  %4013 = vmatprep.subr.bf16.mxu0 %v4143_v46  ;;  %4045 = vmatprep.subr.bf16.mxu1 %v4143_v46 }
 0x510   : > { %v2048_v62 = vadd.f32 %v3905_v47, %v4673_v17  ;;  %v2169_v63 = vadd.f32 %v3937_v48, %v4673_v17 }
 0x511   : > { %v2039_v50 = vpop.f32.mrf.mxu0  ;;  %v2160_v51 = vpop.f32.mrf.mxu1 }
 0x512   : > { %4014 = vmatpush3.bf16.msra.mxu0 %v4143_v46  ;;  %4046 = vmatpush3.bf16.msra.mxu1 %v4143_v46  ;;  %v2040_v58 = vadd.f32 %v2039_v50, %v4673_v17  ;;  %v2161_v59 = vadd.f32 %v2160_v51, %v4673_v17  ;;  %v2092_v11 = vmax.f32 %v2048_v62, 0.0  ;;  %v2213_v12 = vmax.f32 %v2169_v63, 0.0 }
 0x513   : > { %v3906_v52 = vpop.f32.mrf.mxu0  ;;  %v3938_v54 = vpop.f32.mrf.mxu1  ;;  %4015 = vmatprep.subr.bf16.mxu0 %v4144_v49  ;;  %4047 = vmatprep.subr.bf16.mxu1 %v4144_v49 }
 0x514   : > { %v2051_v60 = vadd.f32 %v3906_v52, %v4673_v17  ;;  %v2172_v61 = vadd.f32 %v3938_v54, %v4673_v17  ;;  %v2090_v7 = vmax.f32 %v2040_v58, 0.0  ;;  %v2211_v8 = vmax.f32 %v2161_v59, 0.0 }
 0x515   : > { %v2042_v0 = vpop.f32.mrf.mxu0  ;;  %v2163_v1 = vpop.f32.mrf.mxu1 }
 0x516   : > { %v2043_v2 = vadd.f32 %v2042_v0, %v4673_v17  ;;  %v2164_v3 = vadd.f32 %v2163_v1, %v4673_v17  ;;  %4016 = vmatpush3.bf16.msra.mxu0 %v4144_v49  ;;  %4048 = vmatpush3.bf16.msra.mxu1 %v4144_v49  ;;  %v2093_v4 = vmax.f32 %v2051_v60, 0.0  ;;  %v2214_v5 = vmax.f32 %v2172_v61, 0.0 }
 0x517   : > { %4017 = vmatprep.subr.bf16.mxu0 %v4145_v57  ;;  %4049 = vmatprep.subr.bf16.mxu1 %v4145_v57 }
 0x518   : > { %v2091_v9 = vmax.f32 %v2043_v2, 0.0  ;;  %v2212_v10 = vmax.f32 %v2164_v3, 0.0  ;;  %v2105_v20 = vpack.c.bf16 %v2093_v4, %v2092_v11  ;;  %v2226_v14 = vpack.c.bf16 %v2214_v5, %v2213_v12  ;;  %v4148_v12 = vld [vmem:[%s4829_s2 + $0x188] sm:$0xff]  }
 0x51a   : > { %v2104_v18 = vpack.c.bf16 %v2091_v9, %v2090_v7  ;;  %v2225_v13 = vpack.c.bf16 %v2212_v10, %v2211_v8  ;;  %4018 = vmatpush3.bf16.msra.mxu0 %v4145_v57  ;;  %4050 = vmatpush3.bf16.msra.mxu1 %v4145_v57 }
 0x51b   : > { %4019 = vmatprep.subr.bf16.mxu0 %v4146_v6  ;;  %4051 = vmatprep.subr.bf16.mxu1 %v4146_v6 }
 0x51c   : > { %3967 = vmatprep.mubr.bf16.mxu0 %v2104_v18  ;;  %3999 = vmatprep.mubr.bf16.mxu1 %v2225_v13  ;;  %v4149_v18 = vld [vmem:[%s4829_s2 + $0x180] sm:$0xff]   ;;  %v2250_v13 = vsub.s32 6, %v4359_v53 }
 0x51d   : > { %3968 = vmatmul.mubr.bf16.gmra.mxu0 %v2105_v20  ;;  %4000 = vmatmul.mubr.bf16.gmra.mxu1 %v2226_v14 }
 0x51e   : > { %4020 = vmatpush3.bf16.msra.mxu0 %v4146_v6  ;;  %4052 = vmatpush3.bf16.msra.mxu1 %v4146_v6 }
 0x51f   : > { %v3909_v23 = vpop.f32.mrf.mxu0  ;;  %v3941_v15 = vpop.f32.mrf.mxu1 }
 0x520   : > { %v2064_v28 = vadd.f32 %v3909_v23, %v4673_v17  ;;  %v2185_v29 = vadd.f32 %v3941_v15, %v4673_v17  ;;  %v4730_v23 = vrot.slane %v4550_v56, %v2250_v13 }
 0x521   : > { %v2055_v16 = vpop.f32.mrf.mxu0  ;;  %v2176_v25 = vpop.f32.mrf.mxu1 }
 0x522   : > { %v2056_v22 = vadd.f32 %v2055_v16, %v4673_v17  ;;  %v2177_v24 = vadd.f32 %v2176_v25, %v4673_v17  ;;  %v2096_v39 = vmax.f32 %v2064_v28, 0.0  ;;  %v2217_v40 = vmax.f32 %v2185_v29, 0.0 }
 0x523   : > { %v3910_v19 = vpop.f32.mrf.mxu0  ;;  %v3942_v21 = vpop.f32.mrf.mxu1 }
 0x524   : > { %v2067_v26 = vadd.f32 %v3910_v19, %v4673_v17  ;;  %v2188_v27 = vadd.f32 %v3942_v21, %v4673_v17  ;;  %v2094_v36 = vmax.f32 %v2056_v22, 0.0  ;;  %v2215_v55 = vmax.f32 %v2177_v24, 0.0 }
 0x525   : > { %v2058_v30 = vpop.f32.mrf.mxu0  ;;  %v2179_v31 = vpop.f32.mrf.mxu1 }
 0x526   : > { %v2059_v32 = vadd.f32 %v2058_v30, %v4673_v17  ;;  %v2180_v33 = vadd.f32 %v2179_v31, %v4673_v17  ;;  %v2097_v34 = vmax.f32 %v2067_v26, 0.0  ;;  %v2218_v35 = vmax.f32 %v2188_v27, 0.0 }
 0x528   : > { %v2095_v37 = vmax.f32 %v2059_v32, 0.0  ;;  %v2216_v38 = vmax.f32 %v2180_v33, 0.0  ;;  %v2107_v43 = vpack.c.bf16 %v2097_v34, %v2096_v39  ;;  %v2228_v44 = vpack.c.bf16 %v2218_v35, %v2217_v40 }
 0x52a   : > { %v2106_v41 = vpack.c.bf16 %v2095_v37, %v2094_v36  ;;  %v2227_v42 = vpack.c.bf16 %v2216_v38, %v2215_v55 }
 0x52c   : > { %3971 = vmatprep.mubr.bf16.mxu0 %v2106_v41  ;;  %4003 = vmatprep.mubr.bf16.mxu1 %v2227_v42 }
 0x52d   : > { %3972 = vmatmul.mubr.bf16.gmra.mxu0 %v2107_v43  ;;  %4004 = vmatmul.mubr.bf16.gmra.mxu1 %v2228_v44 }
 0x52f   : > { %v3913_v45 = vpop.f32.mrf.mxu0  ;;  %v3945_v46 = vpop.f32.mrf.mxu1 }
 0x530   : > { %v2080_v58 = vadd.f32 %v3913_v45, %v4673_v17  ;;  %v2201_v59 = vadd.f32 %v3945_v46, %v4673_v17 }
 0x531   : > { %v2071_v47 = vpop.f32.mrf.mxu0  ;;  %v2192_v48 = vpop.f32.mrf.mxu1 }
 0x532   : > { %v2072_v51 = vadd.f32 %v2071_v47, %v4673_v17  ;;  %v2193_v52 = vadd.f32 %v2192_v48, %v4673_v17  ;;  %v2100_v6 = vmax.f32 %v2080_v58, 0.0  ;;  %v2221_v7 = vmax.f32 %v2201_v59, 0.0 }
 0x533   : > { %v3914_v49 = vpop.f32.mrf.mxu0  ;;  %v3946_v50 = vpop.f32.mrf.mxu1 }
 0x534   : > { %v2083_v54 = vadd.f32 %v3914_v49, %v4673_v17  ;;  %v2204_v57 = vadd.f32 %v3946_v50, %v4673_v17  ;;  %v2098_v2 = vmax.f32 %v2072_v51, 0.0  ;;  %v2219_v3 = vmax.f32 %v2193_v52, 0.0 }
 0x535   : > { %v2074_v60 = vpop.f32.mrf.mxu0  ;;  %v2195_v61 = vpop.f32.mrf.mxu1 }
 0x536   : > { %v2075_v62 = vadd.f32 %v2074_v60, %v4673_v17  ;;  %v2196_v63 = vadd.f32 %v2195_v61, %v4673_v17  ;;  %v2101_v0 = vmax.f32 %v2083_v54, 0.0  ;;  %v2222_v1 = vmax.f32 %v2204_v57, 0.0  ;;  %v4147_v17 = vld [vmem:[%s4829_s2 + $0x190] sm:$0xff]  }
 0x537   : > { %4021 = vmatprep.subr.bf16.mxu0 %v4147_v17  ;;  %4053 = vmatprep.subr.bf16.mxu1 %v4147_v17 }
 0x538   : > { %v2099_v4 = vmax.f32 %v2075_v62, 0.0  ;;  %v2220_v5 = vmax.f32 %v2196_v63, 0.0  ;;  %v2109_v10 = vpack.c.bf16 %v2101_v0, %v2100_v6  ;;  %v2230_v11 = vpack.c.bf16 %v2222_v1, %v2221_v7  ;;  %4022 = vmatpush3.bf16.msra.mxu0 %v4147_v17  ;;  %4054 = vmatpush3.bf16.msra.mxu1 %v4147_v17 }
 0x539   : > { %4023 = vmatprep.subr.bf16.mxu0 %v4148_v12  ;;  %4055 = vmatprep.subr.bf16.mxu1 %v4148_v12 }
 0x53a   : > { %v2108_v8 = vpack.c.bf16 %v2099_v4, %v2098_v2  ;;  %v2229_v9 = vpack.c.bf16 %v2220_v5, %v2219_v3 }
 0x53c   : > { %3975 = vmatprep.mubr.bf16.mxu0 %v2108_v8  ;;  %4007 = vmatprep.mubr.bf16.mxu1 %v2229_v9 }
 0x53d   : > { %3976 = vmatmul.mubr.bf16.gmra.mxu0 %v2109_v10  ;;  %4008 = vmatmul.mubr.bf16.gmra.mxu1 %v2230_v11 }
 0x53e   : > { %4024 = vmatpush3.bf16.msra.mxu0 %v4148_v12  ;;  %4056 = vmatpush3.bf16.msra.mxu1 %v4148_v12 }
 0x53f   : > { %4025 = vmatprep.subr.bf16.mxu0 %v4149_v18  ;;  %4057 = vmatprep.subr.bf16.mxu1 %v4149_v18 }
 0x542   : > { %4026 = vmatpush3.bf16.msra.mxu0 %v4149_v18  ;;  %4058 = vmatpush3.bf16.msra.mxu1 %v4149_v18 }
 0x5cd   : > { %v3965_v20 = vpop.f32.mrf.mxu0  ;;  %v3997_v14 = vpop.f32.mrf.mxu1 }
 0x5ce   : > { %v2343_v27 = vadd.f32 %v3965_v20, %v4730_v23  ;;  %v2464_v28 = vadd.f32 %v3997_v14, %v4730_v23 }
 0x5cf   : > { %v2334_v15 = vpop.f32.mrf.mxu0  ;;  %v2455_v16 = vpop.f32.mrf.mxu1 }
 0x5d0   : > { %v2335_v21 = vadd.f32 %v2334_v15, %v4730_v23  ;;  %v2456_v22 = vadd.f32 %v2455_v16, %v4730_v23  ;;  %v2399_v37 = vmax.f32 %v2343_v27, 0.0  ;;  %v2520_v38 = vmax.f32 %v2464_v28, 0.0 }
 0x5d1   : > { %v3966_v25 = vpop.f32.mrf.mxu0  ;;  %v3998_v19 = vpop.f32.mrf.mxu1 }
 0x5d2   : > { %v2346_v24 = vadd.f32 %v3966_v25, %v4730_v23  ;;  %v2467_v26 = vadd.f32 %v3998_v19, %v4730_v23  ;;  %v2397_v34 = vmax.f32 %v2335_v21, 0.0  ;;  %v2518_v35 = vmax.f32 %v2456_v22, 0.0 }
 0x5d3   : > { %v2337_v29 = vpop.f32.mrf.mxu0  ;;  %v2458_v30 = vpop.f32.mrf.mxu1 }
 0x5d4   : > { %v2338_v56 = vadd.f32 %v2337_v29, %v4730_v23  ;;  %v2459_v31 = vadd.f32 %v2458_v30, %v4730_v23  ;;  %v2400_v32 = vmax.f32 %v2346_v24, 0.0  ;;  %v2521_v33 = vmax.f32 %v2467_v26, 0.0 }
 0x5d6   : > { %v2398_v36 = vmax.f32 %v2338_v56, 0.0  ;;  %v2519_v55 = vmax.f32 %v2459_v31, 0.0  ;;  %v2414_v41 = vpack.c.bf16 %v2400_v32, %v2399_v37  ;;  %v2535_v42 = vpack.c.bf16 %v2521_v33, %v2520_v38 }
 0x5d8   : > { %v2413_v39 = vpack.c.bf16 %v2398_v36, %v2397_v34  ;;  %v2534_v40 = vpack.c.bf16 %v2519_v55, %v2518_v35 }
 0x5da   : > { %4027 = vmatprep.mubr.bf16.mxu0 %v2413_v39  ;;  %4059 = vmatprep.mubr.bf16.mxu1 %v2534_v40 }
 0x5db   : > { %4028 = vmatmul.mubr.bf16.vlgmr.msra.gmra.mxu0 %v2414_v41  ;;  %4060 = vmatmul.mubr.bf16.vlgmr.msra.gmra.mxu1 %v2535_v42 }
 0x5dd   : > { %v3969_v43 = vpop.f32.mrf.mxu0  ;;  %v4001_v44 = vpop.f32.mrf.mxu1 }
 0x5de   : > { %v2359_v54 = vadd.f32 %v3969_v43, %v4730_v23  ;;  %v2480_v57 = vadd.f32 %v4001_v44, %v4730_v23 }
 0x5df   : > { %v2350_v45 = vpop.f32.mrf.mxu0  ;;  %v2471_v46 = vpop.f32.mrf.mxu1 }
 0x5e0   : > { %v2351_v49 = vadd.f32 %v2350_v45, %v4730_v23  ;;  %v2472_v50 = vadd.f32 %v2471_v46, %v4730_v23  ;;  %v2403_v4 = vmax.f32 %v2359_v54, 0.0  ;;  %v2524_v5 = vmax.f32 %v2480_v57, 0.0 }
 0x5e1   : > { %v3970_v47 = vpop.f32.mrf.mxu0  ;;  %v4002_v48 = vpop.f32.mrf.mxu1 }
 0x5e2   : > { %v2362_v51 = vadd.f32 %v3970_v47, %v4730_v23  ;;  %v2483_v52 = vadd.f32 %v4002_v48, %v4730_v23  ;;  %v2401_v0 = vmax.f32 %v2351_v49, 0.0  ;;  %v2522_v1 = vmax.f32 %v2472_v50, 0.0 }
 0x5e3   : > { %v2353_v58 = vpop.f32.mrf.mxu0  ;;  %v2474_v59 = vpop.f32.mrf.mxu1 }
 0x5e4   : > { %v2354_v60 = vadd.f32 %v2353_v58, %v4730_v23  ;;  %v2475_v61 = vadd.f32 %v2474_v59, %v4730_v23  ;;  %v2404_v62 = vmax.f32 %v2362_v51, 0.0  ;;  %v2525_v63 = vmax.f32 %v2483_v52, 0.0 }
 0x5e6   : > { %v2402_v2 = vmax.f32 %v2354_v60, 0.0  ;;  %v2523_v3 = vmax.f32 %v2475_v61, 0.0  ;;  %v2416_v8 = vpack.c.bf16 %v2404_v62, %v2403_v4  ;;  %v2537_v9 = vpack.c.bf16 %v2525_v63, %v2524_v5 }
 0x5e7   : > { %v2561_v4 = vsub.s32 7, %v4359_v53 }
 0x5e8   : > { %v2415_v6 = vpack.c.bf16 %v2402_v2, %v2401_v0  ;;  %v2536_v7 = vpack.c.bf16 %v2523_v3, %v2522_v1 }
 0x5ea   : > { %4031 = vmatprep.mubr.bf16.mxu0 %v2415_v6  ;;  %4063 = vmatprep.mubr.bf16.mxu1 %v2536_v7 }
 0x5eb   : > { %4032 = vmatmul.mubr.bf16.gmra.mxu0 %v2416_v8  ;;  %4064 = vmatmul.mubr.bf16.gmra.mxu1 %v2537_v9 }
 0x5ed   : > { %v3973_v10 = vpop.f32.mrf.mxu0  ;;  %v4005_v11 = vpop.f32.mrf.mxu1 }
 0x5ee   : > { %v2375_v25 = vadd.f32 %v3973_v10, %v4730_v23  ;;  %v2496_v19 = vadd.f32 %v4005_v11, %v4730_v23 }
 0x5ef   : > { %v2366_v17 = vpop.f32.mrf.mxu0  ;;  %v2487_v12 = vpop.f32.mrf.mxu1 }
 0x5f0   : > { %v2367_v20 = vadd.f32 %v2366_v17, %v4730_v23  ;;  %v2488_v14 = vadd.f32 %v2487_v12, %v4730_v23  ;;  %v2407_v32 = vmax.f32 %v2375_v25, 0.0  ;;  %v2528_v33 = vmax.f32 %v2496_v19, 0.0 }
 0x5f1   : > { %v3974_v18 = vpop.f32.mrf.mxu0  ;;  %v4006_v13 = vpop.f32.mrf.mxu1 }
 0x5f2   : > { %v2378_v15 = vadd.f32 %v3974_v18, %v4730_v23  ;;  %v2499_v16 = vadd.f32 %v4006_v13, %v4730_v23  ;;  %v2405_v29 = vmax.f32 %v2367_v20, 0.0  ;;  %v2526_v30 = vmax.f32 %v2488_v14, 0.0 }
 0x5f3   : > { %v2369_v21 = vpop.f32.mrf.mxu0  ;;  %v2490_v22 = vpop.f32.mrf.mxu1 }
 0x5f4   : > { %v2370_v24 = vadd.f32 %v2369_v21, %v4730_v23  ;;  %v2491_v26 = vadd.f32 %v2490_v22, %v4730_v23  ;;  %v2408_v27 = vmax.f32 %v2378_v15, 0.0  ;;  %v2529_v28 = vmax.f32 %v2499_v16, 0.0 }
 0x5f6   : > { %v2406_v56 = vmax.f32 %v2370_v24, 0.0  ;;  %v2527_v31 = vmax.f32 %v2491_v26, 0.0  ;;  %v2418_v36 = vpack.c.bf16 %v2408_v27, %v2407_v32  ;;  %v2539_v55 = vpack.c.bf16 %v2529_v28, %v2528_v33 }
 0x5f8   : > { %v2417_v34 = vpack.c.bf16 %v2406_v56, %v2405_v29  ;;  %v2538_v35 = vpack.c.bf16 %v2527_v31, %v2526_v30 }
 0x5fa   : > { %4035 = vmatprep.mubr.bf16.mxu0 %v2417_v34  ;;  %4067 = vmatprep.mubr.bf16.mxu1 %v2538_v35 }
 0x5fb   : > { %4036 = vmatmul.mubr.bf16.gmra.mxu0 %v2418_v36  ;;  %4068 = vmatmul.mubr.bf16.gmra.mxu1 %v2539_v55 }
 0x5fd   : > { %v3977_v37 = vpop.f32.mrf.mxu0  ;;  %v4009_v38 = vpop.f32.mrf.mxu1 }
 0x5fe   : > { %v2391_v47 = vadd.f32 %v3977_v37, %v4730_v23  ;;  %v2512_v48 = vadd.f32 %v4009_v38, %v4730_v23 }
 0x5ff   : > { %v2382_v39 = vpop.f32.mrf.mxu0  ;;  %v2503_v40 = vpop.f32.mrf.mxu1 }
 0x600   : > { %v2383_v43 = vadd.f32 %v2382_v39, %v4730_v23  ;;  %v2504_v44 = vadd.f32 %v2503_v40, %v4730_v23  ;;  %v2411_v62 = vmax.f32 %v2391_v47, 0.0  ;;  %v2532_v63 = vmax.f32 %v2512_v48, 0.0 }
 0x601   : > { %v3978_v41 = vpop.f32.mrf.mxu0  ;;  %v4010_v42 = vpop.f32.mrf.mxu1 }
 0x602   : > { %v2394_v45 = vadd.f32 %v3978_v41, %v4730_v23  ;;  %v2515_v46 = vadd.f32 %v4010_v42, %v4730_v23  ;;  %v2409_v58 = vmax.f32 %v2383_v43, 0.0  ;;  %v2530_v59 = vmax.f32 %v2504_v44, 0.0 }
 0x603   : > { %v2385_v49 = vpop.f32.mrf.mxu0  ;;  %v2506_v50 = vpop.f32.mrf.mxu1 }
 0x604   : > { %v2386_v51 = vadd.f32 %v2385_v49, %v4730_v23  ;;  %v2507_v52 = vadd.f32 %v2506_v50, %v4730_v23  ;;  %v2412_v54 = vmax.f32 %v2394_v45, 0.0  ;;  %v2533_v57 = vmax.f32 %v2515_v46, 0.0  ;;  %v4151_v23 = vld [vmem:[%s4830_s3] sm:$0xff] }
 0x605   : > { %v4768_v5 = vrot.slane %v4151_v23, %v2561_v4 }
 0x606   : > { %v2410_v60 = vmax.f32 %v2386_v51, 0.0  ;;  %v2531_v61 = vmax.f32 %v2507_v52, 0.0  ;;  %v2420_v2 = vpack.c.bf16 %v2412_v54, %v2411_v62  ;;  %v2541_v3 = vpack.c.bf16 %v2533_v57, %v2532_v63 }
 0x608   : > { %v2419_v0 = vpack.c.bf16 %v2410_v60, %v2409_v58  ;;  %v2540_v1 = vpack.c.bf16 %v2531_v61, %v2530_v59 }
 0x60a   : > { %4039 = vmatprep.mubr.bf16.mxu0 %v2419_v0  ;;  %4071 = vmatprep.mubr.bf16.mxu1 %v2540_v1 }
 0x60b   : > { %4040 = vmatmul.mubr.bf16.gmra.mxu0 %v2420_v2  ;;  %4072 = vmatmul.mubr.bf16.gmra.mxu1 %v2541_v3 }
 0x69b   : > { %v4029_v6 = vpop.f32.mrf.mxu0  ;;  %v4061_v7 = vpop.f32.mrf.mxu1 }
 0x69c   : > { %v2654_v8 = vadd.f32 %v4029_v6, %v4768_v5  ;;  %v2775_v9 = vadd.f32 %v4061_v7, %v4768_v5 }
 0x69d   : > { %v2645_v10 = vpop.f32.mrf.mxu0  ;;  %v2766_v11 = vpop.f32.mrf.mxu1 }
 0x69e   : > { %v2646_v17 = vadd.f32 %v2645_v10, %v4768_v5  ;;  %v2767_v12 = vadd.f32 %v2766_v11, %v4768_v5  ;;  %v2710_v14 = vmax.f32 %v2654_v8, 0.0  ;;  %v2831_v15 = vmax.f32 %v2775_v9, 0.0 }
 0x69f   : > { %v4030_v18 = vpop.f32.mrf.mxu0  ;;  %v4062_v53 = vpop.f32.mrf.mxu1 }
 0x6a0   : > { %v2657_v13 = vadd.f32 %v4030_v18, %v4768_v5  ;;  %v2778_v20 = vadd.f32 %v4062_v53, %v4768_v5  ;;  %v2708_v26 = vmax.f32 %v2646_v17, 0.0  ;;  %v2829_v27 = vmax.f32 %v2767_v12, 0.0 }
 0x6a1   : > { %v2648_v16 = vpop.f32.mrf.mxu0  ;;  %v2769_v25 = vpop.f32.mrf.mxu1 }
 0x6a2   : > { %v2711_v19 = vmax.f32 %v2657_v13, 0.0  ;;  %v2832_v21 = vmax.f32 %v2778_v20, 0.0  ;;  %v2649_v22 = vadd.f32 %v2648_v16, %v4768_v5  ;;  %v2770_v24 = vadd.f32 %v2769_v25, %v4768_v5 }
 0x6a4   : > { %v3316_v28 = vpack.c.bf16 %v2711_v19, %v2710_v14  ;;  %v3356_v29 = vpack.c.bf16 %v2832_v21, %v2831_v15  ;;  %v2709_v30 = vmax.f32 %v2649_v22, 0.0  ;;  %v2830_v56 = vmax.f32 %v2770_v24, 0.0 }
 0x6a6   : > { %3388 = vst [vmem:[%s4782_s19 + $0x8] sm:$0xff] %v3316_v28   ;;  %3396 = vst [vmem:[%s4782_s19 + $0x48] sm:$0xff] %v3356_v29   ;;  %v3311_v31 = vpack.c.bf16 %v2709_v30, %v2708_v26  ;;  %v3351_v32 = vpack.c.bf16 %v2830_v56, %v2829_v27 }
 0x6a8   : > { %3312 = vst [vmem:[%s4782_s19] sm:$0xff] %v3311_v31   ;;  %3395 = vst [vmem:[%s4782_s19 + $0x40] sm:$0xff] %v3351_v32  }
 0x6ab   : > { %v4033_v33 = vpop.f32.mrf.mxu0  ;;  %v4065_v34 = vpop.f32.mrf.mxu1 }
 0x6ac   : > { %v2670_v35 = vadd.f32 %v4033_v33, %v4768_v5  ;;  %v2791_v36 = vadd.f32 %v4065_v34, %v4768_v5 }
 0x6ad   : > { %v2661_v55 = vpop.f32.mrf.mxu0  ;;  %v2782_v37 = vpop.f32.mrf.mxu1 }
 0x6ae   : > { %v2662_v38 = vadd.f32 %v2661_v55, %v4768_v5  ;;  %v2783_v39 = vadd.f32 %v2782_v37, %v4768_v5  ;;  %v2714_v44 = vmax.f32 %v2670_v35, 0.0  ;;  %v2835_v45 = vmax.f32 %v2791_v36, 0.0 }
 0x6af   : > { %v4034_v40 = vpop.f32.mrf.mxu0  ;;  %v4066_v41 = vpop.f32.mrf.mxu1 }
 0x6b0   : > { %v2673_v42 = vadd.f32 %v4034_v40, %v4768_v5  ;;  %v2794_v43 = vadd.f32 %v4066_v41, %v4768_v5  ;;  %v2712_v52 = vmax.f32 %v2662_v38, 0.0  ;;  %v2833_v54 = vmax.f32 %v2783_v39, 0.0 }
 0x6b1   : > { %v2664_v46 = vpop.f32.mrf.mxu0  ;;  %v2785_v47 = vpop.f32.mrf.mxu1 }
 0x6b2   : > { %v2715_v48 = vmax.f32 %v2673_v42, 0.0  ;;  %v2836_v49 = vmax.f32 %v2794_v43, 0.0  ;;  %v2665_v50 = vadd.f32 %v2664_v46, %v4768_v5  ;;  %v2786_v51 = vadd.f32 %v2785_v47, %v4768_v5 }
 0x6b4   : > { %v3326_v57 = vpack.c.bf16 %v2715_v48, %v2714_v44  ;;  %v3366_v58 = vpack.c.bf16 %v2836_v49, %v2835_v45  ;;  %v2713_v59 = vmax.f32 %v2665_v50, 0.0  ;;  %v2834_v60 = vmax.f32 %v2786_v51, 0.0 }
 0x6b6   : > { %3390 = vst [vmem:[%s4782_s19 + $0x18] sm:$0xff] %v3326_v57   ;;  %3398 = vst [vmem:[%s4782_s19 + $0x58] sm:$0xff] %v3366_v58   ;;  %v3321_v61 = vpack.c.bf16 %v2713_v59, %v2712_v52  ;;  %v3361_v62 = vpack.c.bf16 %v2834_v60, %v2833_v54 }
 0x6b8   : > { %3389 = vst [vmem:[%s4782_s19 + $0x10] sm:$0xff] %v3321_v61   ;;  %3397 = vst [vmem:[%s4782_s19 + $0x50] sm:$0xff] %v3361_v62  }
 0x6bb   : > { %v4037_v63 = vpop.f32.mrf.mxu0  ;;  %v4069_v0 = vpop.f32.mrf.mxu1 }
 0x6bc   : > { %v2686_v1 = vadd.f32 %v4037_v63, %v4768_v5  ;;  %v2807_v2 = vadd.f32 %v4069_v0, %v4768_v5 }
 0x6bd   : > { %v2677_v3 = vpop.f32.mrf.mxu0  ;;  %v2798_v4 = vpop.f32.mrf.mxu1 }
 0x6be   : > { %v2678_v23 = vadd.f32 %v2677_v3, %v4768_v5  ;;  %v2799_v6 = vadd.f32 %v2798_v4, %v4768_v5  ;;  %v2718_v11 = vmax.f32 %v2686_v1, 0.0  ;;  %v2839_v17 = vmax.f32 %v2807_v2, 0.0 }
 0x6bf   : > { %v4038_v7 = vpop.f32.mrf.mxu0  ;;  %v4070_v8 = vpop.f32.mrf.mxu1 }
 0x6c0   : > { %v2689_v9 = vadd.f32 %v4038_v7, %v4768_v5  ;;  %v2810_v10 = vadd.f32 %v4070_v8, %v4768_v5  ;;  %v2716_v15 = vmax.f32 %v2678_v23, 0.0  ;;  %v2837_v16 = vmax.f32 %v2799_v6, 0.0 }
 0x6c1   : > { %v2680_v12 = vpop.f32.mrf.mxu0  ;;  %v2801_v18 = vpop.f32.mrf.mxu1 }
 0x6c2   : > { %v2719_v53 = vmax.f32 %v2689_v9, 0.0  ;;  %v2840_v13 = vmax.f32 %v2810_v10, 0.0  ;;  %v2681_v20 = vadd.f32 %v2680_v12, %v4768_v5  ;;  %v2802_v14 = vadd.f32 %v2801_v18, %v4768_v5 }
 0x6c4   : > { %v3336_v25 = vpack.c.bf16 %v2719_v53, %v2718_v11  ;;  %v3376_v19 = vpack.c.bf16 %v2840_v13, %v2839_v17  ;;  %v2717_v21 = vmax.f32 %v2681_v20, 0.0  ;;  %v2838_v22 = vmax.f32 %v2802_v14, 0.0 }
 0x6c6   : > { %3392 = vst [vmem:[%s4782_s19 + $0x28] sm:$0xff] %v3336_v25   ;;  %3400 = vst [vmem:[%s4782_s19 + $0x68] sm:$0xff] %v3376_v19   ;;  %v3331_v24 = vpack.c.bf16 %v2717_v21, %v2716_v15  ;;  %v3371_v26 = vpack.c.bf16 %v2838_v22, %v2837_v16 }
 0x6c8   : > { %3391 = vst [vmem:[%s4782_s19 + $0x20] sm:$0xff] %v3331_v24   ;;  %3399 = vst [vmem:[%s4782_s19 + $0x60] sm:$0xff] %v3371_v26  }
 0x6cb   : > { %v4041_v27 = vpop.f32.mrf.mxu0  ;;  %v4073_v28 = vpop.f32.mrf.mxu1 }
 0x6cc   : > { %v2702_v29 = vadd.f32 %v4041_v27, %v4768_v5  ;;  %v2823_v30 = vadd.f32 %v4073_v28, %v4768_v5 }
 0x6cd   : > { %v2693_v56 = vpop.f32.mrf.mxu0  ;;  %v2814_v31 = vpop.f32.mrf.mxu1 }
 0x6ce   : > { %v2694_v32 = vadd.f32 %v2693_v56, %v4768_v5  ;;  %v2815_v33 = vadd.f32 %v2814_v31, %v4768_v5  ;;  %v2722_v37 = vmax.f32 %v2702_v29, 0.0  ;;  %v2843_v38 = vmax.f32 %v2823_v30, 0.0 }
 0x6cf   : > { %v4042_v34 = vpop.f32.mrf.mxu0  ;;  %v4074_v35 = vpop.f32.mrf.mxu1 }
 0x6d0   : > { %v2705_v36 = vadd.f32 %v4042_v34, %v4768_v5  ;;  %v2826_v55 = vadd.f32 %v4074_v35, %v4768_v5  ;;  %v2720_v45 = vmax.f32 %v2694_v32, 0.0  ;;  %v2841_v46 = vmax.f32 %v2815_v33, 0.0 }
 0x6d1   : > { %v2696_v39 = vpop.f32.mrf.mxu0  ;;  %v2817_v40 = vpop.f32.mrf.mxu1 }
 0x6d2   : > { %v2723_v41 = vmax.f32 %v2705_v36, 0.0  ;;  %v2844_v42 = vmax.f32 %v2826_v55, 0.0  ;;  %v2697_v43 = vadd.f32 %v2696_v39, %v4768_v5  ;;  %v2818_v44 = vadd.f32 %v2817_v40, %v4768_v5 }
 0x6d4   : > { %v3346_v47 = vpack.c.bf16 %v2723_v41, %v2722_v37  ;;  %v3386_v48 = vpack.c.bf16 %v2844_v42, %v2843_v38  ;;  %v2721_v49 = vmax.f32 %v2697_v43, 0.0  ;;  %v2842_v50 = vmax.f32 %v2818_v44, 0.0 }
 0x6d6   : > { %3394 = vst [vmem:[%s4782_s19 + $0x38] sm:$0xff] %v3346_v47   ;;  %3402 = vst [vmem:[%s4782_s19 + $0x78] sm:$0xff] %v3386_v48   ;;  %v3341_v51 = vpack.c.bf16 %v2721_v49, %v2720_v45  ;;  %v3381_v52 = vpack.c.bf16 %v2842_v50, %v2841_v46 }
 0x6d8   : > { %3393 = vst [vmem:[%s4782_s19 + $0x30] sm:$0xff] %v3341_v51   ;;  %3401 = vst [vmem:[%s4782_s19 + $0x70] sm:$0xff] %v3381_v52  }
 0x6d9 PF: > { %s14_s15 = sadd.s32 1, %s4158_s15  }
 0x6da   : > { %p11_p4 = scmp.ge.s32.totalorder %s14_s15, 4  }
 0x6dc   :  { %13 = sbr.rel (!%p11_p4) target bundleno = 1 (0x1), region = 72 }

</bundles_post_ra>
